<compile_context>
chip_gen: v5e
topology: v5e:2x2
jax: 0.10.0
libtpu: 0.0.40
codegen_flags: <defaults>
</compile_context>

<pallas_src>
import numpy as np
import jax
import jax.numpy as jnp
from jax.experimental import pallas as pl
from jax.experimental.pallas import tpu as pltpu

# ---------------- small synthetic T5 config ----------------
VOCAB = 128
D_MODEL = 32
N_HEADS = 4
D_KV = 8                  # per-head dim
INNER = N_HEADS * D_KV    # == D_MODEL
D_FF = 64
N_LAYERS = 2
NUM_BUCKETS = 32
MAX_DISTANCE = 128
EPS = 1e-6
NEG_INF = -1e9
PAD_ID = 0                # T5: pad_token_id == decoder_start_token_id == 0
IGNORE_INDEX = -100

VMEM_LIMIT = 32 * 1024 * 1024


def _compiler_params(semantics):
    return pltpu.CompilerParams(dimension_semantics=semantics,
                                vmem_limit_bytes=VMEM_LIMIT)


def _cost(flops, transcendentals, bytes_accessed):
    return pl.CostEstimate(flops=int(flops), transcendentals=int(transcendentals),
                           bytes_accessed=int(bytes_accessed))


# ---------------- in-kernel helpers ----------------
def _rms(x, w):
    # T5LayerNorm: no mean subtraction, no bias.  x f32, w (1, D) f32.
    var = jnp.mean(x * x, axis=-1, keepdims=True)
    return x * jax.lax.rsqrt(var + EPS) * w


def _attend(q, k, v, bias):
    # q: (Tq, INNER) f32; k, v: (Tk, INNER) f32; bias: (H, Tq, Tk) f32.
    # T5 attention has NO 1/sqrt(d) scaling.  Per-head unrolled (H=4) 2-D dots.
    outs = []
    for h in range(N_HEADS):
        sl = slice(h * D_KV, (h + 1) * D_KV)
        s = jax.lax.dot_general(q[:, sl], k[:, sl], (((1,), (1,)), ((), ())),
                                preferred_element_type=jnp.float32) + bias[h]
        s = s - jnp.max(s, axis=-1, keepdims=True)
        p = jnp.exp(s)
        p = p * pl.reciprocal(jnp.sum(p, axis=-1, keepdims=True), approx=True)
        outs.append(jnp.dot(p, v[:, sl], preferred_element_type=jnp.float32))
    return jnp.concatenate(outs, axis=-1)   # (Tq, INNER)


# ---------------- fused Pallas kernels ----------------
def _encoder_layer_kernel(h_ref, ln1_ref, wqkv_ref, wo_ref, ln2_ref, wi_ref,
                          woff_ref, bias_ref, mask_ref, o_ref):
    h = h_ref[0]                                            # (T, D) f32
    # --- self-attention sub-block (fused qkv) ---
    n = _rms(h, ln1_ref[...])
    qkv = jnp.dot(n.astype(jnp.bfloat16), wqkv_ref[...],
                  preferred_element_type=jnp.float32)       # (T, 3*INNER)
    bias = bias_ref[...] + mask_ref[0]                      # (H, T, T)
    ctx = _attend(qkv[:, :INNER], qkv[:, INNER:2 * INNER], qkv[:, 2 * INNER:], bias)
    h = h + jnp.dot(ctx.astype(jnp.bfloat16), wo_ref[...],
                    preferred_element_type=jnp.float32)
    # --- FFN sub-block (DenseReluDense, no biases) ---
    n = _rms(h, ln2_ref[...])
    ff = jnp.dot(n.astype(jnp.bfloat16), wi_ref[...],
                 preferred_element_type=jnp.float32)
    ff = jnp.maximum(ff, 0.0)
    ff = jnp.dot(ff.astype(jnp.bfloat16), woff_ref[...],
                 preferred_element_type=jnp.float32)
    o_ref[0] = (h + ff).astype(o_ref.dtype)


def _decoder_layer_kernel(h_ref, enc_ref, ln1_ref, swqkv_ref, swo_ref,
                          ln2_ref, cwq_ref, cwkv_ref, cwo_ref,
                          ln3_ref, wi_ref, woff_ref,
                          sbias_ref, smask_ref, cmask_ref, o_ref):
    h = h_ref[0]                                            # (Td, D)
    enc = enc_ref[0]                                        # (Te, D)
    td = h.shape[0]
    te = enc.shape[0]
    # --- self attention ---
    n = _rms(h, ln1_ref[...])
    qkv = jnp.dot(n.astype(jnp.bfloat16), swqkv_ref[...],
                  preferred_element_type=jnp.float32)
    bias = sbias_ref[...] + smask_ref[0]
    ctx = _attend(qkv[:, :INNER], qkv[:, INNER:2 * INNER], qkv[:, 2 * INNER:], bias)
    h = h + jnp.dot(ctx.astype(jnp.bfloat16), swo_ref[...],
                    preferred_element_type=jnp.float32)
    # --- cross attention (no relative position bias in T5 cross attention) ---
    n = _rms(h, ln2_ref[...])
    q = jnp.dot(n.astype(jnp.bfloat16), cwq_ref[...],
                preferred_element_type=jnp.float32)
    kv = jnp.dot(enc.astype(jnp.bfloat16), cwkv_ref[...],
                 preferred_element_type=jnp.float32)
    cbias = jnp.broadcast_to(cmask_ref[0], (N_HEADS, td, te))
    ctx = _attend(q, kv[:, :INNER], kv[:, INNER:], cbias)
    h = h + jnp.dot(ctx.astype(jnp.bfloat16), cwo_ref[...],
                    preferred_element_type=jnp.float32)
    # --- FFN ---
    n = _rms(h, ln3_ref[...])
    ff = jnp.dot(n.astype(jnp.bfloat16), wi_ref[...],
                 preferred_element_type=jnp.float32)
    ff = jnp.maximum(ff, 0.0)
    ff = jnp.dot(ff.astype(jnp.bfloat16), woff_ref[...],
                 preferred_element_type=jnp.float32)
    o_ref[0] = (h + ff).astype(o_ref.dtype)


def _rmsnorm_kernel(x_ref, w_ref, o_ref):
    o_ref[...] = _rms(x_ref[...], w_ref[...]).astype(o_ref.dtype)


def _lm_head_xent_kernel(h_ref, ln_ref, lmw_ref, lab_ref, logits_ref, loss_ref):
    # fused: decoder final RMSNorm + tied lm_head (scaled by d_model**-0.5)
    # + per-token cross-entropy.
    h = h_ref[0]                                            # (Td, D) f32
    n = _rms(h, ln_ref[...]) * (D_MODEL ** -0.5)
    logits = jnp.dot(n.astype(jnp.bfloat16), lmw_ref[...],
                     preferred_element_type=jnp.float32)    # (Td, V)
    logits_ref[0] = logits.astype(logits_ref.dtype)
    labels = lab_ref[0]                                     # (Td, 1) int32
    m = jnp.max(logits, axis=-1, keepdims=True)
    lse = jnp.log(jnp.sum(jnp.exp(logits - m), axis=-1, keepdims=True)) + m
    iota = jax.lax.broadcasted_iota(jnp.int32, logits.shape, 1)
    label_logit = jnp.sum(jnp.where(iota == labels, logits, 0.0),
                          axis=-1, keepdims=True)
    loss_ref[0] = (lse - label_logit).astype(loss_ref.dtype)


# ---------------- pallas_call wrappers ----------------
def _row3(i):
    return (i, 0, 0)


def _full2(i):
    return (0, 0)


def _full3(i):
    return (0, 0, 0)


def encoder_layer(h, layer, pos_bias, mask_add):
    B, T, D = h.shape
    flops = B * (2 * T * D * 3 * INNER + 4 * N_HEADS * T * T * D_KV
                 + 2 * T * INNER * D + 4 * T * D * D_FF)
    bytes_acc = (2 * B * T * D * 4
                 + (D * 3 * INNER + INNER * D + 2 * D * D_FF) * 2
                 + N_HEADS * T * T * 4 + B * T * 4)
    return pl.pallas_call(
        _encoder_layer_kernel,
        grid=(B,),
        in_specs=[
            pl.BlockSpec((1, T, D), _row3),
            pl.BlockSpec((1, D), _full2),
            pl.BlockSpec(layer['wqkv'].shape, _full2),
            pl.BlockSpec(layer['wo'].shape, _full2),
            pl.BlockSpec((1, D), _full2),
            pl.BlockSpec(layer['wi'].shape, _full2),
            pl.BlockSpec(layer['wo_ff'].shape, _full2),
            pl.BlockSpec(pos_bias.shape, _full3),
            pl.BlockSpec((1, 1, mask_add.shape[-1]), _row3),
        ],
        out_specs=pl.BlockSpec((1, T, D), _row3),
        out_shape=jax.ShapeDtypeStruct((B, T, D), jnp.float32),
        compiler_params=_compiler_params(("parallel",)),
        cost_estimate=_cost(flops, B * N_HEADS * T * T, bytes_acc),
    )(h, layer['ln1'], layer['wqkv'], layer['wo'], layer['ln2'],
      layer['wi'], layer['wo_ff'], pos_bias, mask_add)


def decoder_layer(h, enc_out, layer, pos_bias, self_mask_add, cross_mask_add):
    B, Td, D = h.shape
    Te = enc_out.shape[1]
    flops = B * (2 * Td * D * 3 * INNER + 4 * Td * INNER * D
                 + 2 * Td * D * INNER + 2 * Te * D * 2 * INNER
                 + 4 * N_HEADS * Td * (Td + Te) * D_KV + 4 * Td * D * D_FF)
    bytes_acc = (2 * B * Td * D * 4 + B * Te * D * 4
                 + (3 * INNER * D + 2 * INNER * D + INNER * D
                    + 2 * INNER * D + 2 * D * D_FF) * 2
                 + N_HEADS * Td * Td * 4 + B * Td * Td * 4 + B * Te * 4)
    return pl.pallas_call(
        _decoder_layer_kernel,
        grid=(B,),
        in_specs=[
            pl.BlockSpec((1, Td, D), _row3),
            pl.BlockSpec((1, Te, D), _row3),
            pl.BlockSpec((1, D), _full2),
            pl.BlockSpec(layer['s_wqkv'].shape, _full2),
            pl.BlockSpec(layer['s_wo'].shape, _full2),
            pl.BlockSpec((1, D), _full2),
            pl.BlockSpec(layer['c_wq'].shape, _full2),
            pl.BlockSpec(layer['c_wkv'].shape, _full2),
            pl.BlockSpec(layer['c_wo'].shape, _full2),
            pl.BlockSpec((1, D), _full2),
            pl.BlockSpec(layer['wi'].shape, _full2),
            pl.BlockSpec(layer['wo_ff'].shape, _full2),
            pl.BlockSpec(pos_bias.shape, _full3),
            pl.BlockSpec((1, Td, Td), _row3),
            pl.BlockSpec((1, 1, Te), _row3),
        ],
        out_specs=pl.BlockSpec((1, Td, D), _row3),
        out_shape=jax.ShapeDtypeStruct((B, Td, D), jnp.float32),
        compiler_params=_compiler_params(("parallel",)),
        cost_estimate=_cost(flops, B * N_HEADS * Td * (Td + Te), bytes_acc),
    )(h, enc_out, layer['ln1'], layer['s_wqkv'], layer['s_wo'],
      layer['ln2'], layer['c_wq'], layer['c_wkv'], layer['c_wo'],
      layer['ln3'], layer['wi'], layer['wo_ff'],
      pos_bias, self_mask_add, cross_mask_add)


def rmsnorm_final(x, w):
    B, T, D = x.shape
    return pl.pallas_call(
        _rmsnorm_kernel,
        grid=(1,),
        in_specs=[pl.BlockSpec((B, T, D), _full3),
                  pl.BlockSpec((1, D), _full2)],
        out_specs=pl.BlockSpec((B, T, D), _full3),
        out_shape=jax.ShapeDtypeStruct((B, T, D), jnp.float32),
        compiler_params=_compiler_params(("arbitrary",)),
        cost_estimate=_cost(4 * B * T * D, B * T, 2 * B * T * D * 4),
    )(x, w)


def lm_head_and_loss(dec_h, ln_w, lm_w, labels):
    B, T, D = dec_h.shape
    V = lm_w.shape[1]
    labels3 = labels.reshape(B, T, 1).astype(jnp.int32)
    logits, per_tok = pl.pallas_call(
        _lm_head_xent_kernel,
        grid=(B,),
        in_specs=[
            pl.BlockSpec((1, T, D), _row3),
            pl.BlockSpec((1, D), _full2),
            pl.BlockSpec((D, V), _full2),
            pl.BlockSpec((1, T, 1), _row3),
        ],
        out_specs=(pl.BlockSpec((1, T, V), _row3),
                   pl.BlockSpec((1, T, 1), _row3)),
        out_shape=(jax.ShapeDtypeStruct((B, T, V), jnp.float32),
                   jax.ShapeDtypeStruct((B, T, 1), jnp.float32)),
        compiler_params=_compiler_params(("parallel",)),
        cost_estimate=_cost(2 * B * T * D * V, B * T * V,
                            B * T * D * 4 + D * V * 2 + B * T * V * 4),
    )(dec_h, ln_w, lm_w, labels3)
    return logits, per_tok


# ---------------- JAX glue: relative position bias ----------------
def _relative_position_bucket(relative_position, bidirectional,
                              num_buckets=NUM_BUCKETS, max_distance=MAX_DISTANCE):
    relative_buckets = jnp.zeros_like(relative_position)
    if bidirectional:
        num_buckets //= 2
        relative_buckets = relative_buckets + (
            (relative_position > 0).astype(relative_position.dtype) * num_buckets)
        relative_position = jnp.abs(relative_position)
    else:
        relative_position = -jnp.minimum(relative_position, 0)
    max_exact = num_buckets // 2
    is_small = relative_position < max_exact
    rel_f = jnp.maximum(relative_position, 1).astype(jnp.float32)
    rel_if_large = max_exact + (
        jnp.log(rel_f / max_exact) / np.log(max_distance / max_exact)
        * (num_buckets - max_exact)).astype(relative_position.dtype)
    rel_if_large = jnp.minimum(rel_if_large, num_buckets - 1)
    return relative_buckets + jnp.where(is_small, relative_position, rel_if_large)


def compute_position_bias(table, q_len, k_len, bidirectional):
    ctx = jnp.arange(q_len, dtype=jnp.int32)[:, None]
    mem = jnp.arange(k_len, dtype=jnp.int32)[None, :]
    bucket = _relative_position_bucket(mem - ctx, bidirectional)
    values = table[bucket]                  # (q, k, H)
    return values.transpose(2, 0, 1)        # (H, q, k)


# ---------------- parameters ----------------
def init_params(key):
    keys = iter(jax.random.split(key, 64))

    def nrm(shape, std=0.05, dtype=jnp.bfloat16):
        return (jax.random.normal(next(keys), shape, jnp.float32) * std).astype(dtype)

    params = {
        'embed': nrm((VOCAB, D_MODEL), 1.0 / np.sqrt(D_MODEL), jnp.float32),
        'enc_rel_bias': nrm((NUM_BUCKETS, N_HEADS), 0.1, jnp.float32),
        'dec_rel_bias': nrm((NUM_BUCKETS, N_HEADS), 0.1, jnp.float32),
        'enc_final_ln': jnp.ones((1, D_MODEL), jnp.float32),
        'dec_final_ln': jnp.ones((1, D_MODEL), jnp.float32),
        'enc_layers': [],
        'dec_layers': [],
    }
    for _ in range(N_LAYERS):
        params['enc_layers'].append(dict(
            ln1=jnp.ones((1, D_MODEL), jnp.float32),
            wqkv=nrm((D_MODEL, 3 * INNER)),      # fused Q|K|V
            wo=nrm((INNER, D_MODEL)),
            ln2=jnp.ones((1, D_MODEL), jnp.float32),
            wi=nrm((D_MODEL, D_FF)),
            wo_ff=nrm((D_FF, D_MODEL)),
        ))
        params['dec_layers'].append(dict(
            ln1=jnp.ones((1, D_MODEL), jnp.float32),
            s_wqkv=nrm((D_MODEL, 3 * INNER)),    # fused self Q|K|V
            s_wo=nrm((INNER, D_MODEL)),
            ln2=jnp.ones((1, D_MODEL), jnp.float32),
            c_wq=nrm((D_MODEL, INNER)),
            c_wkv=nrm((D_MODEL, 2 * INNER)),     # fused cross K|V
            c_wo=nrm((INNER, D_MODEL)),
            ln3=jnp.ones((1, D_MODEL), jnp.float32),
            wi=nrm((D_MODEL, D_FF)),
            wo_ff=nrm((D_FF, D_MODEL)),
        ))
    return params


# ---------------- forward (mirrors T5ForConditionalGeneration.forward) ----------------
def _encode(params, input_ids, attention_mask):
    embed = params['embed']
    te = input_ids.shape[1]
    h = embed[input_ids]                                        # gather (glue)
    enc_mask_add = ((1.0 - attention_mask.astype(jnp.float32)) * NEG_INF)[:, None, :]
    enc_pos_bias = compute_position_bias(params['enc_rel_bias'], te, te, True)
    for layer in params['enc_layers']:
        h = encoder_layer(h, layer, enc_pos_bias, enc_mask_add)
    return rmsnorm_final(h, params['enc_final_ln'])


def _forward(params, input_ids, attention_mask, labels, decoder_attention_mask):
    embed = params['embed']
    b = input_ids.shape[0]
    enc_out = _encode(params, input_ids, attention_mask)

    # decoder input = shift_right(labels)
    dec_input_ids = jnp.concatenate(
        [jnp.full((b, 1), PAD_ID, labels.dtype), labels[:, :-1]], axis=1)
    dec_input_ids = jnp.where(dec_input_ids == IGNORE_INDEX, PAD_ID, dec_input_ids)
    td = dec_input_ids.shape[1]
    te = input_ids.shape[1]

    h = embed[dec_input_ids]
    causal = jnp.tril(jnp.ones((td, td), jnp.float32))
    self_keep = causal[None, :, :] * decoder_attention_mask.astype(jnp.float32)[:, None, :]
    self_mask_add = (1.0 - self_keep) * NEG_INF                                 # (B, Td, Td)
    cross_mask_add = ((1.0 - attention_mask.astype(jnp.float32)) * NEG_INF)[:, None, :]  # (B,1,Te)
    dec_pos_bias = compute_position_bias(params['dec_rel_bias'], td, td, False)

    for layer in params['dec_layers']:
        h = decoder_layer(h, enc_out, layer, dec_pos_bias,
                          self_mask_add, cross_mask_add)

    # tied lm_head: final norm + d_model**-0.5 scale + embed^T projection + xent (fused kernel)
    lm_w = embed.T.astype(jnp.bfloat16)
    logits, per_tok = lm_head_and_loss(h, params['dec_final_ln'], lm_w, labels)

    valid = (labels != IGNORE_INDEX).astype(jnp.float32)
    loss = jnp.sum(per_tok[..., 0] * valid) / jnp.maximum(jnp.sum(valid), 1.0)
    return loss, logits


class ReviewGenerator:
    def __init__(self, key=None):
        if key is None:
            key = jax.random.PRNGKey(0)
        self.params = init_params(key)
        self._fwd = jax.jit(_forward)
        self._enc = jax.jit(_encode)
        # TODO(synk): gradient_checkpointing_enable() is a training-memory feature
        # with no effect on forward semantics; not represented in the kernels.

    def __call__(self, input_ids, attention_mask, labels=None,
                 decoder_attention_mask=None):
        if labels is None:
            enc_out = self._enc(self.params, input_ids, attention_mask)
            return {'loss': None, 'logits': None,
                    'encoder_last_hidden_state': enc_out}
        if decoder_attention_mask is None:
            decoder_attention_mask = jnp.ones(labels.shape, jnp.int32)
        loss, logits = self._fwd(self.params, input_ids, attention_mask,
                                 labels, decoder_attention_mask)
        return {'loss': loss, 'logits': logits}


if __name__ == "__main__":
    key = jax.random.PRNGKey(0)
    k_in, k_lab, k_par = jax.random.split(key, 3)

    batch, enc_seq, dec_seq = 2, 8, 8
    input_ids = jax.random.randint(k_in, (batch, enc_seq), 1, VOCAB, dtype=jnp.int32)
    attention_mask = jnp.ones((batch, enc_seq), jnp.int32)
    labels = jax.random.randint(k_lab, (batch, dec_seq), 1, VOCAB, dtype=jnp.int32)
    decoder_attention_mask = jnp.ones((batch, dec_seq), jnp.int32)

    model = ReviewGenerator(k_par)
    outputs = model(input_ids, attention_mask, labels=labels,
                    decoder_attention_mask=decoder_attention_mask)

    jax.block_until_ready(outputs['loss'])
    jax.block_until_ready(outputs['logits'])
    assert outputs['logits'].shape == (batch, dec_seq, VOCAB)
    assert np.isfinite(float(outputs['loss']))
    print("KERNEL_OK")
</pallas_src>

<mosaic_0001>
module attributes {stable_mosaic.version = 11 : i64} {
  func.func @_rmsnorm_kernel(%arg0: i32, %arg1: memref<2x8x32xf32, #tpu.memory_space<vmem>>, %arg2: memref<1x32xf32, #tpu.memory_space<vmem>>, %arg3: memref<2x8x32xf32, #tpu.memory_space<vmem>>) attributes {dimension_semantics = [#tpu.dimension_semantics<arbitrary>], iteration_bounds = array<i64: 1>, scalar_prefetch = 0 : i64, scratch_operands = 0 : i64, tpu.core_type = #tpu.core_type<tc>, window_params = [{pipeline_mode = #tpu.pipeline_mode<synchronous>, transform_indices = @transform_0, window_bounds = array<i64: 2, 8, 32>}, {pipeline_mode = #tpu.pipeline_mode<synchronous>, transform_indices = @transform_1, window_bounds = array<i64: 1, 32>}, {pipeline_mode = #tpu.pipeline_mode<synchronous>, transform_indices = @transform_2, window_bounds = array<i64: 2, 8, 32>}]} {
    %c0 = arith.constant 0 : index
    %c0_0 = arith.constant 0 : index
    %c0_1 = arith.constant 0 : index
    %0 = vector.load %arg1[%c0, %c0_0, %c0_1] : memref<2x8x32xf32, #tpu.memory_space<vmem>>, vector<2x8x32xf32>
    %c0_2 = arith.constant 0 : index
    %c0_3 = arith.constant 0 : index
    %1 = vector.load %arg2[%c0_2, %c0_3] : memref<1x32xf32, #tpu.memory_space<vmem>>, vector<1x32xf32>
    %2 = arith.mulf %0, %0 : vector<2x8x32xf32>
    %cst = arith.constant dense<0.000000e+00> : vector<2x8xf32>
    %3 = vector.multi_reduction <add>, %2, %cst [2] : vector<2x8x32xf32> to vector<2x8xf32>
    %4 = vector.shape_cast %3 : vector<2x8xf32> to vector<2x8x1xf32>
    %cst_4 = arith.constant 3.200000e+01 : f32
    %5 = vector.broadcast %cst_4 : f32 to vector<2x8x1xf32>
    %6 = arith.divf %4, %5 : vector<2x8x1xf32>
    %cst_5 = arith.constant 9.99999997E-7 : f32
    %7 = vector.broadcast %cst_5 : f32 to vector<2x8x1xf32>
    %8 = arith.addf %6, %7 : vector<2x8x1xf32>
    %9 = math.rsqrt %8 : vector<2x8x1xf32>
    %10 = vector.broadcast %9 : vector<2x8x1xf32> to vector<2x8x32xf32>
    %11 = arith.mulf %0, %10 : vector<2x8x32xf32>
    %12 = vector.shape_cast %1 : vector<1x32xf32> to vector<1x1x32xf32>
    %13 = vector.broadcast %12 : vector<1x1x32xf32> to vector<2x8x32xf32>
    %14 = arith.mulf %11, %13 : vector<2x8x32xf32>
    %c0_6 = arith.constant 0 : index
    %c0_7 = arith.constant 0 : index
    %c0_8 = arith.constant 0 : index
    %15 = vector.load %arg3[%c0_6, %c0_7, %c0_8] : memref<2x8x32xf32, #tpu.memory_space<vmem>>, vector<2x8x32xf32>
    tpu.vector_store %arg3[%c0_6, %c0_7, %c0_8], %14 {strides = array<i32>} : memref<2x8x32xf32, #tpu.memory_space<vmem>>, vector<2x8x32xf32>,
    return
  }
  func.func @transform_0(%arg0: i32) -> (i32, i32, i32) {
    %c0_i32 = arith.constant 0 : i32
    %c0_i32_0 = arith.constant 0 : i32
    %c0_i32_1 = arith.constant 0 : i32
    %c0_i32_2 = arith.constant 0 : i32
    return %c0_i32, %c0_i32_0, %c0_i32_1 : i32, i32, i32
  }
  func.func @transform_1(%arg0: i32) -> (i32, i32) {
    %c0_i32 = arith.constant 0 : i32
    %c0_i32_0 = arith.constant 0 : i32
    %c0_i32_1 = arith.constant 0 : i32
    return %c0_i32, %c0_i32_0 : i32, i32
  }
  func.func @transform_2(%arg0: i32) -> (i32, i32, i32) {
    %c0_i32 = arith.constant 0 : i32
    %c0_i32_0 = arith.constant 0 : i32
    %c0_i32_1 = arith.constant 0 : i32
    %c0_i32_2 = arith.constant 0 : i32
    return %c0_i32, %c0_i32_0, %c0_i32_1 : i32, i32, i32
  }
}

module attributes {stable_mosaic.version = 11 : i64} {
  func.func @_encoder_layer_kernel(%arg0: i32, %arg1: memref<1x8x32xf32, #tpu.memory_space<vmem>>, %arg2: memref<1x32xf32, #tpu.memory_space<vmem>>, %arg3: memref<32x96xbf16, #tpu.memory_space<vmem>>, %arg4: memref<32x32xbf16, #tpu.memory_space<vmem>>, %arg5: memref<1x32xf32, #tpu.memory_space<vmem>>, %arg6: memref<32x64xbf16, #tpu.memory_space<vmem>>, %arg7: memref<64x32xbf16, #tpu.memory_space<vmem>>, %arg8: memref<4x8x8xf32, #tpu.memory_space<vmem>>, %arg9: memref<1x1x8xf32, #tpu.memory_space<vmem>>, %arg10: memref<1x8x32xf32, #tpu.memory_space<vmem>>) attributes {dimension_semantics = [#tpu.dimension_semantics<parallel>], iteration_bounds = array<i64: 2>, scalar_prefetch = 0 : i64, scratch_operands = 0 : i64, tpu.core_type = #tpu.core_type<tc>, window_params = [{transform_indices = @transform_0, window_bounds = array<i64: 1, 8, 32>}, {pipeline_mode = #tpu.pipeline_mode<synchronous>, transform_indices = @transform_1, window_bounds = array<i64: 1, 32>}, {pipeline_mode = #tpu.pipeline_mode<synchronous>, transform_indices = @transform_2, window_bounds = array<i64: 32, 96>}, {pipeline_mode = #tpu.pipeline_mode<synchronous>, transform_indices = @transform_3, window_bounds = array<i64: 32, 32>}, {pipeline_mode = #tpu.pipeline_mode<synchronous>, transform_indices = @transform_4, window_bounds = array<i64: 1, 32>}, {pipeline_mode = #tpu.pipeline_mode<synchronous>, transform_indices = @transform_5, window_bounds = array<i64: 32, 64>}, {pipeline_mode = #tpu.pipeline_mode<synchronous>, transform_indices = @transform_6, window_bounds = array<i64: 64, 32>}, {pipeline_mode = #tpu.pipeline_mode<synchronous>, transform_indices = @transform_7, window_bounds = array<i64: 4, 8, 8>}, {transform_indices = @transform_8, window_bounds = array<i64: 1, 1, 8>}, {transform_indices = @transform_9, window_bounds = array<i64: 1, 8, 32>}]} {
    %c0 = arith.constant 0 : index
    %c0_0 = arith.constant 0 : index
    %c0_1 = arith.constant 0 : index
    %0 = vector.load %arg1[%c0, %c0_0, %c0_1] : memref<1x8x32xf32, #tpu.memory_space<vmem>>, vector<1x8x32xf32>
    %1 = vector.shape_cast %0 : vector<1x8x32xf32> to vector<8x32xf32>
    %c0_2 = arith.constant 0 : index
    %c0_3 = arith.constant 0 : index
    %2 = vector.load %arg2[%c0_2, %c0_3] : memref<1x32xf32, #tpu.memory_space<vmem>>, vector<1x32xf32>
    %3 = arith.mulf %1, %1 : vector<8x32xf32>
    %cst = arith.constant dense<0.000000e+00> : vector<8xf32>
    %4 = vector.multi_reduction <add>, %3, %cst [1] : vector<8x32xf32> to vector<8xf32>
    %5 = vector.shape_cast %4 : vector<8xf32> to vector<8x1xf32>
    %cst_4 = arith.constant 3.200000e+01 : f32
    %6 = vector.broadcast %cst_4 : f32 to vector<8x1xf32>
    %7 = arith.divf %5, %6 : vector<8x1xf32>
    %cst_5 = arith.constant 9.99999997E-7 : f32
    %8 = vector.broadcast %cst_5 : f32 to vector<8x1xf32>
    %9 = arith.addf %7, %8 : vector<8x1xf32>
    %10 = math.rsqrt %9 : vector<8x1xf32>
    %11 = vector.broadcast %10 : vector<8x1xf32> to vector<8x32xf32>
    %12 = arith.mulf %1, %11 : vector<8x32xf32>
    %13 = vector.broadcast %2 : vector<1x32xf32> to vector<8x32xf32>
    %14 = arith.mulf %12, %13 : vector<8x32xf32>
    %15 = arith.truncf %14 : vector<8x32xf32> to vector<8x32xbf16>
    %c0_6 = arith.constant 0 : index
    %c0_7 = arith.constant 0 : index
    %16 = vector.load %arg3[%c0_6, %c0_7] : memref<32x96xbf16, #tpu.memory_space<vmem>>, vector<32x96xbf16>
    %cst_8 = arith.constant dense<0.000000e+00> : vector<8x96xf32>
    %17 = tpu.matmul %15, %16, %cst_8 {dimension_numbers = #tpu.dot_dimension_numbers<[1], [0], [0], [1], [0, 0, 1, 1], [], []>} : vector<8x32xbf16>, vector<32x96xbf16>, vector<8x96xf32> -> vector<8x96xf32>
    %c0_9 = arith.constant 0 : index
    %c0_10 = arith.constant 0 : index
    %c0_11 = arith.constant 0 : index
    %18 = vector.load %arg8[%c0_9, %c0_10, %c0_11] : memref<4x8x8xf32, #tpu.memory_space<vmem>>, vector<4x8x8xf32>
    %c0_12 = arith.constant 0 : index
    %c0_13 = arith.constant 0 : index
    %c0_14 = arith.constant 0 : index
    %19 = vector.load %arg9[%c0_12, %c0_13, %c0_14] : memref<1x1x8xf32, #tpu.memory_space<vmem>>, vector<1x1x8xf32>
    %20 = vector.shape_cast %19 : vector<1x1x8xf32> to vector<1x8xf32>
    %21 = vector.shape_cast %20 : vector<1x8xf32> to vector<1x1x8xf32>
    %22 = vector.broadcast %21 : vector<1x1x8xf32> to vector<4x8x8xf32>
    %23 = arith.addf %18, %22 : vector<4x8x8xf32>
    %24 = vector.extract_strided_slice %17 {offsets = [0, 0], sizes = [8, 32], strides = [1, 1]} : vector<8x96xf32> to vector<8x32xf32>
    %25 = vector.extract_strided_slice %17 {offsets = [0, 32], sizes = [8, 32], strides = [1, 1]} : vector<8x96xf32> to vector<8x32xf32>
    %26 = vector.extract_strided_slice %17 {offsets = [0, 64], sizes = [8, 32], strides = [1, 1]} : vector<8x96xf32> to vector<8x32xf32>
    %27 = vector.extract_strided_slice %24 {offsets = [0, 0], sizes = [8, 8], strides = [1, 1]} : vector<8x32xf32> to vector<8x8xf32>
    %28 = vector.extract_strided_slice %25 {offsets = [0, 0], sizes = [8, 8], strides = [1, 1]} : vector<8x32xf32> to vector<8x8xf32>
    %cst_15 = arith.constant dense<0.000000e+00> : vector<8x8xf32>
    %29 = tpu.matmul %27, %28, %cst_15 {dimension_numbers = #tpu.dot_dimension_numbers<[1], [1], [0], [0], [0, 0, 1, 0], [], []>} : vector<8x8xf32>, vector<8x8xf32>, vector<8x8xf32> -> vector<8x8xf32>
    %30 = vector.extract_strided_slice %23 {offsets = [0, 0, 0], sizes = [1, 8, 8], strides = [1, 1, 1]} : vector<4x8x8xf32> to vector<1x8x8xf32>
    %31 = vector.shape_cast %30 : vector<1x8x8xf32> to vector<8x8xf32>
    %32 = arith.addf %29, %31 : vector<8x8xf32>
    %cst_16 = arith.constant dense<0xFF800000> : vector<8xf32>
    %33 = vector.multi_reduction <maximumf>, %32, %cst_16 [1] : vector<8x8xf32> to vector<8xf32>
    %34 = vector.shape_cast %33 : vector<8xf32> to vector<8x1xf32>
    %35 = vector.broadcast %34 : vector<8x1xf32> to vector<8x8xf32>
    %36 = arith.subf %32, %35 : vector<8x8xf32>
    %37 = math.exp %36 : vector<8x8xf32>
    %cst_17 = arith.constant dense<0.000000e+00> : vector<8xf32>
    %38 = vector.multi_reduction <add>, %37, %cst_17 [1] : vector<8x8xf32> to vector<8xf32>
    %39 = vector.shape_cast %38 : vector<8xf32> to vector<8x1xf32>
    %40 = tpu.reciprocal %39 {approx = true} : vector<8x1xf32> -> vector<8x1xf32>
    %41 = vector.broadcast %40 : vector<8x1xf32> to vector<8x8xf32>
    %42 = arith.mulf %37, %41 : vector<8x8xf32>
    %43 = vector.extract_strided_slice %26 {offsets = [0, 0], sizes = [8, 8], strides = [1, 1]} : vector<8x32xf32> to vector<8x8xf32>
    %cst_18 = arith.constant dense<0.000000e+00> : vector<8x8xf32>
    %44 = tpu.matmul %42, %43, %cst_18 {dimension_numbers = #tpu.dot_dimension_numbers<[1], [0], [0], [1], [0, 0, 1, 1], [], []>} : vector<8x8xf32>, vector<8x8xf32>, vector<8x8xf32> -> vector<8x8xf32>
    %45 = vector.extract_strided_slice %24 {offsets = [0, 8], sizes = [8, 8], strides = [1, 1]} : vector<8x32xf32> to vector<8x8xf32>
    %46 = vector.extract_strided_slice %25 {offsets = [0, 8], sizes = [8, 8], strides = [1, 1]} : vector<8x32xf32> to vector<8x8xf32>
    %cst_19 = arith.constant dense<0.000000e+00> : vector<8x8xf32>
    %47 = tpu.matmul %45, %46, %cst_19 {dimension_numbers = #tpu.dot_dimension_numbers<[1], [1], [0], [0], [0, 0, 1, 0], [], []>} : vector<8x8xf32>, vector<8x8xf32>, vector<8x8xf32> -> vector<8x8xf32>
    %48 = vector.extract_strided_slice %23 {offsets = [1, 0, 0], sizes = [1, 8, 8], strides = [1, 1, 1]} : vector<4x8x8xf32> to vector<1x8x8xf32>
    %49 = vector.shape_cast %48 : vector<1x8x8xf32> to vector<8x8xf32>
    %50 = arith.addf %47, %49 : vector<8x8xf32>
    %cst_20 = arith.constant dense<0xFF800000> : vector<8xf32>
    %51 = vector.multi_reduction <maximumf>, %50, %cst_20 [1] : vector<8x8xf32> to vector<8xf32>
    %52 = vector.shape_cast %51 : vector<8xf32> to vector<8x1xf32>
    %53 = vector.broadcast %52 : vector<8x1xf32> to vector<8x8xf32>
    %54 = arith.subf %50, %53 : vector<8x8xf32>
    %55 = math.exp %54 : vector<8x8xf32>
    %cst_21 = arith.constant dense<0.000000e+00> : vector<8xf32>
    %56 = vector.multi_reduction <add>, %55, %cst_21 [1] : vector<8x8xf32> to vector<8xf32>
    %57 = vector.shape_cast %56 : vector<8xf32> to vector<8x1xf32>
    %58 = tpu.reciprocal %57 {approx = true} : vector<8x1xf32> -> vector<8x1xf32>
    %59 = vector.broadcast %58 : vector<8x1xf32> to vector<8x8xf32>
    %60 = arith.mulf %55, %59 : vector<8x8xf32>
    %61 = vector.extract_strided_slice %26 {offsets = [0, 8], sizes = [8, 8], strides = [1, 1]} : vector<8x32xf32> to vector<8x8xf32>
    %cst_22 = arith.constant dense<0.000000e+00> : vector<8x8xf32>
    %62 = tpu.matmul %60, %61, %cst_22 {dimension_numbers = #tpu.dot_dimension_numbers<[1], [0], [0], [1], [0, 0, 1, 1], [], []>} : vector<8x8xf32>, vector<8x8xf32>, vector<8x8xf32> -> vector<8x8xf32>
    %63 = vector.extract_strided_slice %24 {offsets = [0, 16], sizes = [8, 8], strides = [1, 1]} : vector<8x32xf32> to vector<8x8xf32>
    %64 = vector.extract_strided_slice %25 {offsets = [0, 16], sizes = [8, 8], strides = [1, 1]} : vector<8x32xf32> to vector<8x8xf32>
    %cst_23 = arith.constant dense<0.000000e+00> : vector<8x8xf32>
    %65 = tpu.matmul %63, %64, %cst_23 {dimension_numbers = #tpu.dot_dimension_numbers<[1], [1], [0], [0], [0, 0, 1, 0], [], []>} : vector<8x8xf32>, vector<8x8xf32>, vector<8x8xf32> -> vector<8x8xf32>
    %66 = vector.extract_strided_slice %23 {offsets = [2, 0, 0], sizes = [1, 8, 8], strides = [1, 1, 1]} : vector<4x8x8xf32> to vector<1x8x8xf32>
    %67 = vector.shape_cast %66 : vector<1x8x8xf32> to vector<8x8xf32>
    %68 = arith.addf %65, %67 : vector<8x8xf32>
    %cst_24 = arith.constant dense<0xFF800000> : vector<8xf32>
    %69 = vector.multi_reduction <maximumf>, %68, %cst_24 [1] : vector<8x8xf32> to vector<8xf32>
    %70 = vector.shape_cast %69 : vector<8xf32> to vector<8x1xf32>
    %71 = vector.broadcast %70 : vector<8x1xf32> to vector<8x8xf32>
    %72 = arith.subf %68, %71 : vector<8x8xf32>
    %73 = math.exp %72 : vector<8x8xf32>
    %cst_25 = arith.constant dense<0.000000e+00> : vector<8xf32>
    %74 = vector.multi_reduction <add>, %73, %cst_25 [1] : vector<8x8xf32> to vector<8xf32>
    %75 = vector.shape_cast %74 : vector<8xf32> to vector<8x1xf32>
    %76 = tpu.reciprocal %75 {approx = true} : vector<8x1xf32> -> vector<8x1xf32>
    %77 = vector.broadcast %76 : vector<8x1xf32> to vector<8x8xf32>
    %78 = arith.mulf %73, %77 : vector<8x8xf32>
    %79 = vector.extract_strided_slice %26 {offsets = [0, 16], sizes = [8, 8], strides = [1, 1]} : vector<8x32xf32> to vector<8x8xf32>
    %cst_26 = arith.constant dense<0.000000e+00> : vector<8x8xf32>
    %80 = tpu.matmul %78, %79, %cst_26 {dimension_numbers = #tpu.dot_dimension_numbers<[1], [0], [0], [1], [0, 0, 1, 1], [], []>} : vector<8x8xf32>, vector<8x8xf32>, vector<8x8xf32> -> vector<8x8xf32>
    %81 = vector.extract_strided_slice %24 {offsets = [0, 24], sizes = [8, 8], strides = [1, 1]} : vector<8x32xf32> to vector<8x8xf32>
    %82 = vector.extract_strided_slice %25 {offsets = [0, 24], sizes = [8, 8], strides = [1, 1]} : vector<8x32xf32> to vector<8x8xf32>
    %cst_27 = arith.constant dense<0.000000e+00> : vector<8x8xf32>
    %83 = tpu.matmul %81, %82, %cst_27 {dimension_numbers = #tpu.dot_dimension_numbers<[1], [1], [0], [0], [0, 0, 1, 0], [], []>} : vector<8x8xf32>, vector<8x8xf32>, vector<8x8xf32> -> vector<8x8xf32>
    %84 = vector.extract_strided_slice %23 {offsets = [3, 0, 0], sizes = [1, 8, 8], strides = [1, 1, 1]} : vector<4x8x8xf32> to vector<1x8x8xf32>
    %85 = vector.shape_cast %84 : vector<1x8x8xf32> to vector<8x8xf32>
    %86 = arith.addf %83, %85 : vector<8x8xf32>
    %cst_28 = arith.constant dense<0xFF800000> : vector<8xf32>
    %87 = vector.multi_reduction <maximumf>, %86, %cst_28 [1] : vector<8x8xf32> to vector<8xf32>
    %88 = vector.shape_cast %87 : vector<8xf32> to vector<8x1xf32>
    %89 = vector.broadcast %88 : vector<8x1xf32> to vector<8x8xf32>
    %90 = arith.subf %86, %89 : vector<8x8xf32>
    %91 = math.exp %90 : vector<8x8xf32>
    %cst_29 = arith.constant dense<0.000000e+00> : vector<8xf32>
    %92 = vector.multi_reduction <add>, %91, %cst_29 [1] : vector<8x8xf32> to vector<8xf32>
    %93 = vector.shape_cast %92 : vector<8xf32> to vector<8x1xf32>
    %94 = tpu.reciprocal %93 {approx = true} : vector<8x1xf32> -> vector<8x1xf32>
    %95 = vector.broadcast %94 : vector<8x1xf32> to vector<8x8xf32>
    %96 = arith.mulf %91, %95 : vector<8x8xf32>
    %97 = vector.extract_strided_slice %26 {offsets = [0, 24], sizes = [8, 8], strides = [1, 1]} : vector<8x32xf32> to vector<8x8xf32>
    %cst_30 = arith.constant dense<0.000000e+00> : vector<8x8xf32>
    %98 = tpu.matmul %96, %97, %cst_30 {dimension_numbers = #tpu.dot_dimension_numbers<[1], [0], [0], [1], [0, 0, 1, 1], [], []>} : vector<8x8xf32>, vector<8x8xf32>, vector<8x8xf32> -> vector<8x8xf32>
    %99 = tpu.concatenate %44, %62, %80, %98 in 1 : vector<8x8xf32>, vector<8x8xf32>, vector<8x8xf32>, vector<8x8xf32> -> vector<8x32xf32>
    %100 = arith.truncf %99 : vector<8x32xf32> to vector<8x32xbf16>
    %c0_31 = arith.constant 0 : index
    %c0_32 = arith.constant 0 : index
    %101 = vector.load %arg4[%c0_31, %c0_32] : memref<32x32xbf16, #tpu.memory_space<vmem>>, vector<32x32xbf16>
    %cst_33 = arith.constant dense<0.000000e+00> : vector<8x32xf32>
    %102 = tpu.matmul %100, %101, %cst_33 {dimension_numbers = #tpu.dot_dimension_numbers<[1], [0], [0], [1], [0, 0, 1, 1], [], []>} : vector<8x32xbf16>, vector<32x32xbf16>, vector<8x32xf32> -> vector<8x32xf32>
    %103 = arith.addf %1, %102 : vector<8x32xf32>
    %c0_34 = arith.constant 0 : index
    %c0_35 = arith.constant 0 : index
    %104 = vector.load %arg5[%c0_34, %c0_35] : memref<1x32xf32, #tpu.memory_space<vmem>>, vector<1x32xf32>
    %105 = arith.mulf %103, %103 : vector<8x32xf32>
    %cst_36 = arith.constant dense<0.000000e+00> : vector<8xf32>
    %106 = vector.multi_reduction <add>, %105, %cst_36 [1] : vector<8x32xf32> to vector<8xf32>
    %107 = vector.shape_cast %106 : vector<8xf32> to vector<8x1xf32>
    %cst_37 = arith.constant 3.200000e+01 : f32
    %108 = vector.broadcast %cst_37 : f32 to vector<8x1xf32>
    %109 = arith.divf %107, %108 : vector<8x1xf32>
    %cst_38 = arith.constant 9.99999997E-7 : f32
    %110 = vector.broadcast %cst_38 : f32 to vector<8x1xf32>
    %111 = arith.addf %109, %110 : vector<8x1xf32>
    %112 = math.rsqrt %111 : vector<8x1xf32>
    %113 = vector.broadcast %112 : vector<8x1xf32> to vector<8x32xf32>
    %114 = arith.mulf %103, %113 : vector<8x32xf32>
    %115 = vector.broadcast %104 : vector<1x32xf32> to vector<8x32xf32>
    %116 = arith.mulf %114, %115 : vector<8x32xf32>
    %117 = arith.truncf %116 : vector<8x32xf32> to vector<8x32xbf16>
    %c0_39 = arith.constant 0 : index
    %c0_40 = arith.constant 0 : index
    %118 = vector.load %arg6[%c0_39, %c0_40] : memref<32x64xbf16, #tpu.memory_space<vmem>>, vector<32x64xbf16>
    %cst_41 = arith.constant dense<0.000000e+00> : vector<8x64xf32>
    %119 = tpu.matmul %117, %118, %cst_41 {dimension_numbers = #tpu.dot_dimension_numbers<[1], [0], [0], [1], [0, 0, 1, 1], [], []>} : vector<8x32xbf16>, vector<32x64xbf16>, vector<8x64xf32> -> vector<8x64xf32>
    %cst_42 = arith.constant 0.000000e+00 : f32
    %120 = vector.broadcast %cst_42 : f32 to vector<8x64xf32>
    %121 = arith.maximumf %119, %120 : vector<8x64xf32>
    %122 = arith.truncf %121 : vector<8x64xf32> to vector<8x64xbf16>
    %c0_43 = arith.constant 0 : index
    %c0_44 = arith.constant 0 : index
    %123 = vector.load %arg7[%c0_43, %c0_44] : memref<64x32xbf16, #tpu.memory_space<vmem>>, vector<64x32xbf16>
    %cst_45 = arith.constant dense<0.000000e+00> : vector<8x32xf32>
    %124 = tpu.matmul %122, %123, %cst_45 {dimension_numbers = #tpu.dot_dimension_numbers<[1], [0], [0], [1], [0, 0, 1, 1], [], []>} : vector<8x64xbf16>, vector<64x32xbf16>, vector<8x32xf32> -> vector<8x32xf32>
    %125 = arith.addf %103, %124 : vector<8x32xf32>
    %c0_46 = arith.constant 0 : index
    %c0_47 = arith.constant 0 : index
    %c0_48 = arith.constant 0 : index
    %126 = vector.load %arg10[%c0_46, %c0_47, %c0_48] : memref<1x8x32xf32, #tpu.memory_space<vmem>>, vector<1x8x32xf32>
    %127 = vector.shape_cast %126 : vector<1x8x32xf32> to vector<8x32xf32>
    %128 = vector.shape_cast %125 : vector<8x32xf32> to vector<1x8x32xf32>
    tpu.vector_store %arg10[%c0_46, %c0_47, %c0_48], %128 {strides = array<i32>} : memref<1x8x32xf32, #tpu.memory_space<vmem>>, vector<1x8x32xf32>,
    return
  }
  func.func @transform_0(%arg0: i32) -> (i32, i32, i32) {
    %c0_i32 = arith.constant 0 : i32
    %c0_i32_0 = arith.constant 0 : i32
    %c0_i32_1 = arith.constant 0 : i32
    return %arg0, %c0_i32, %c0_i32_0 : i32, i32, i32
  }
  func.func @transform_1(%arg0: i32) -> (i32, i32) {
    %c0_i32 = arith.constant 0 : i32
    %c0_i32_0 = arith.constant 0 : i32
    %c0_i32_1 = arith.constant 0 : i32
    return %c0_i32, %c0_i32_0 : i32, i32
  }
  func.func @transform_2(%arg0: i32) -> (i32, i32) {
    %c0_i32 = arith.constant 0 : i32
    %c0_i32_0 = arith.constant 0 : i32
    %c0_i32_1 = arith.constant 0 : i32
    return %c0_i32, %c0_i32_0 : i32, i32
  }
  func.func @transform_3(%arg0: i32) -> (i32, i32) {
    %c0_i32 = arith.constant 0 : i32
    %c0_i32_0 = arith.constant 0 : i32
    %c0_i32_1 = arith.constant 0 : i32
    return %c0_i32, %c0_i32_0 : i32, i32
  }
  func.func @transform_4(%arg0: i32) -> (i32, i32) {
    %c0_i32 = arith.constant 0 : i32
    %c0_i32_0 = arith.constant 0 : i32
    %c0_i32_1 = arith.constant 0 : i32
    return %c0_i32, %c0_i32_0 : i32, i32
  }
  func.func @transform_5(%arg0: i32) -> (i32, i32) {
    %c0_i32 = arith.constant 0 : i32
    %c0_i32_0 = arith.constant 0 : i32
    %c0_i32_1 = arith.constant 0 : i32
    return %c0_i32, %c0_i32_0 : i32, i32
  }
  func.func @transform_6(%arg0: i32) -> (i32, i32) {
    %c0_i32 = arith.constant 0 : i32
    %c0_i32_0 = arith.constant 0 : i32
    %c0_i32_1 = arith.constant 0 : i32
    return %c0_i32, %c0_i32_0 : i32, i32
  }
  func.func @transform_7(%arg0: i32) -> (i32, i32, i32) {
    %c0_i32 = arith.constant 0 : i32
    %c0_i32_0 = arith.constant 0 : i32
    %c0_i32_1 = arith.constant 0 : i32
    %c0_i32_2 = arith.constant 0 : i32
    return %c0_i32, %c0_i32_0, %c0_i32_1 : i32, i32, i32
  }
  func.func @transform_8(%arg0: i32) -> (i32, i32, i32) {
    %c0_i32 = arith.constant 0 : i32
    %c0_i32_0 = arith.constant 0 : i32
    %c0_i32_1 = arith.constant 0 : i32
    return %arg0, %c0_i32, %c0_i32_0 : i32, i32, i32
  }
  func.func @transform_9(%arg0: i32) -> (i32, i32, i32) {
    %c0_i32 = arith.constant 0 : i32
    %c0_i32_0 = arith.constant 0 : i32
    %c0_i32_1 = arith.constant 0 : i32
    return %arg0, %c0_i32, %c0_i32_0 : i32, i32, i32
  }
}

module attributes {stable_mosaic.version = 11 : i64} {
  func.func @_decoder_layer_kernel(%arg0: i32, %arg1: memref<1x8x32xf32, #tpu.memory_space<vmem>>, %arg2: memref<1x8x32xf32, #tpu.memory_space<vmem>>, %arg3: memref<1x32xf32, #tpu.memory_space<vmem>>, %arg4: memref<32x96xbf16, #tpu.memory_space<vmem>>, %arg5: memref<32x32xbf16, #tpu.memory_space<vmem>>, %arg6: memref<1x32xf32, #tpu.memory_space<vmem>>, %arg7: memref<32x32xbf16, #tpu.memory_space<vmem>>, %arg8: memref<32x64xbf16, #tpu.memory_space<vmem>>, %arg9: memref<32x32xbf16, #tpu.memory_space<vmem>>, %arg10: memref<1x32xf32, #tpu.memory_space<vmem>>, %arg11: memref<32x64xbf16, #tpu.memory_space<vmem>>, %arg12: memref<64x32xbf16, #tpu.memory_space<vmem>>, %arg13: memref<4x8x8xf32, #tpu.memory_space<vmem>>, %arg14: memref<1x8x8xf32, #tpu.memory_space<vmem>>, %arg15: memref<1x1x8xf32, #tpu.memory_space<vmem>>, %arg16: memref<1x8x32xf32, #tpu.memory_space<vmem>>) attributes {dimension_semantics = [#tpu.dimension_semantics<parallel>], iteration_bounds = array<i64: 2>, scalar_prefetch = 0 : i64, scratch_operands = 0 : i64, tpu.core_type = #tpu.core_type<tc>, window_params = [{transform_indices = @transform_0, window_bounds = array<i64: 1, 8, 32>}, {transform_indices = @transform_1, window_bounds = array<i64: 1, 8, 32>}, {pipeline_mode = #tpu.pipeline_mode<synchronous>, transform_indices = @transform_2, window_bounds = array<i64: 1, 32>}, {pipeline_mode = #tpu.pipeline_mode<synchronous>, transform_indices = @transform_3, window_bounds = array<i64: 32, 96>}, {pipeline_mode = #tpu.pipeline_mode<synchronous>, transform_indices = @transform_4, window_bounds = array<i64: 32, 32>}, {pipeline_mode = #tpu.pipeline_mode<synchronous>, transform_indices = @transform_5, window_bounds = array<i64: 1, 32>}, {pipeline_mode = #tpu.pipeline_mode<synchronous>, transform_indices = @transform_6, window_bounds = array<i64: 32, 32>}, {pipeline_mode = #tpu.pipeline_mode<synchronous>, transform_indices = @transform_7, window_bounds = array<i64: 32, 64>}, {pipeline_mode = #tpu.pipeline_mode<synchronous>, transform_indices = @transform_8, window_bounds = array<i64: 32, 32>}, {pipeline_mode = #tpu.pipeline_mode<synchronous>, transform_indices = @transform_9, window_bounds = array<i64: 1, 32>}, {pipeline_mode = #tpu.pipeline_mode<synchronous>, transform_indices = @transform_10, window_bounds = array<i64: 32, 64>}, {pipeline_mode = #tpu.pipeline_mode<synchronous>, transform_indices = @transform_11, window_bounds = array<i64: 64, 32>}, {pipeline_mode = #tpu.pipeline_mode<synchronous>, transform_indices = @transform_12, window_bounds = array<i64: 4, 8, 8>}, {transform_indices = @transform_13, window_bounds = array<i64: 1, 8, 8>}, {transform_indices = @transform_14, window_bounds = array<i64: 1, 1, 8>}, {transform_indices = @transform_15, window_bounds = array<i64: 1, 8, 32>}]} {
    %c0 = arith.constant 0 : index
    %c0_0 = arith.constant 0 : index
    %c0_1 = arith.constant 0 : index
    %0 = vector.load %arg1[%c0, %c0_0, %c0_1] : memref<1x8x32xf32, #tpu.memory_space<vmem>>, vector<1x8x32xf32>
    %1 = vector.shape_cast %0 : vector<1x8x32xf32> to vector<8x32xf32>
    %c0_2 = arith.constant 0 : index
    %c0_3 = arith.constant 0 : index
    %c0_4 = arith.constant 0 : index
    %2 = vector.load %arg2[%c0_2, %c0_3, %c0_4] : memref<1x8x32xf32, #tpu.memory_space<vmem>>, vector<1x8x32xf32>
    %3 = vector.shape_cast %2 : vector<1x8x32xf32> to vector<8x32xf32>
    %c0_5 = arith.constant 0 : index
    %c0_6 = arith.constant 0 : index
    %4 = vector.load %arg3[%c0_5, %c0_6] : memref<1x32xf32, #tpu.memory_space<vmem>>, vector<1x32xf32>
    %5 = arith.mulf %1, %1 : vector<8x32xf32>
    %cst = arith.constant dense<0.000000e+00> : vector<8xf32>
    %6 = vector.multi_reduction <add>, %5, %cst [1] : vector<8x32xf32> to vector<8xf32>
    %7 = vector.shape_cast %6 : vector<8xf32> to vector<8x1xf32>
    %cst_7 = arith.constant 3.200000e+01 : f32
    %8 = vector.broadcast %cst_7 : f32 to vector<8x1xf32>
    %9 = arith.divf %7, %8 : vector<8x1xf32>
    %cst_8 = arith.constant 9.99999997E-7 : f32
    %10 = vector.broadcast %cst_8 : f32 to vector<8x1xf32>
    %11 = arith.addf %9, %10 : vector<8x1xf32>
    %12 = math.rsqrt %11 : vector<8x1xf32>
    %13 = vector.broadcast %12 : vector<8x1xf32> to vector<8x32xf32>
    %14 = arith.mulf %1, %13 : vector<8x32xf32>
    %15 = vector.broadcast %4 : vector<1x32xf32> to vector<8x32xf32>
    %16 = arith.mulf %14, %15 : vector<8x32xf32>
    %17 = arith.truncf %16 : vector<8x32xf32> to vector<8x32xbf16>
    %c0_9 = arith.constant 0 : index
    %c0_10 = arith.constant 0 : index
    %18 = vector.load %arg4[%c0_9, %c0_10] : memref<32x96xbf16, #tpu.memory_space<vmem>>, vector<32x96xbf16>
    %cst_11 = arith.constant dense<0.000000e+00> : vector<8x96xf32>
    %19 = tpu.matmul %17, %18, %cst_11 {dimension_numbers = #tpu.dot_dimension_numbers<[1], [0], [0], [1], [0, 0, 1, 1], [], []>} : vector<8x32xbf16>, vector<32x96xbf16>, vector<8x96xf32> -> vector<8x96xf32>
    %c0_12 = arith.constant 0 : index
    %c0_13 = arith.constant 0 : index
    %c0_14 = arith.constant 0 : index
    %20 = vector.load %arg13[%c0_12, %c0_13, %c0_14] : memref<4x8x8xf32, #tpu.memory_space<vmem>>, vector<4x8x8xf32>
    %c0_15 = arith.constant 0 : index
    %c0_16 = arith.constant 0 : index
    %c0_17 = arith.constant 0 : index
    %21 = vector.load %arg14[%c0_15, %c0_16, %c0_17] : memref<1x8x8xf32, #tpu.memory_space<vmem>>, vector<1x8x8xf32>
    %22 = vector.shape_cast %21 : vector<1x8x8xf32> to vector<8x8xf32>
    %23 = vector.shape_cast %22 : vector<8x8xf32> to vector<1x8x8xf32>
    %24 = vector.broadcast %23 : vector<1x8x8xf32> to vector<4x8x8xf32>
    %25 = arith.addf %20, %24 : vector<4x8x8xf32>
    %26 = vector.extract_strided_slice %19 {offsets = [0, 0], sizes = [8, 32], strides = [1, 1]} : vector<8x96xf32> to vector<8x32xf32>
    %27 = vector.extract_strided_slice %19 {offsets = [0, 32], sizes = [8, 32], strides = [1, 1]} : vector<8x96xf32> to vector<8x32xf32>
    %28 = vector.extract_strided_slice %19 {offsets = [0, 64], sizes = [8, 32], strides = [1, 1]} : vector<8x96xf32> to vector<8x32xf32>
    %29 = vector.extract_strided_slice %26 {offsets = [0, 0], sizes = [8, 8], strides = [1, 1]} : vector<8x32xf32> to vector<8x8xf32>
    %30 = vector.extract_strided_slice %27 {offsets = [0, 0], sizes = [8, 8], strides = [1, 1]} : vector<8x32xf32> to vector<8x8xf32>
    %cst_18 = arith.constant dense<0.000000e+00> : vector<8x8xf32>
    %31 = tpu.matmul %29, %30, %cst_18 {dimension_numbers = #tpu.dot_dimension_numbers<[1], [1], [0], [0], [0, 0, 1, 0], [], []>} : vector<8x8xf32>, vector<8x8xf32>, vector<8x8xf32> -> vector<8x8xf32>
    %32 = vector.extract_strided_slice %25 {offsets = [0, 0, 0], sizes = [1, 8, 8], strides = [1, 1, 1]} : vector<4x8x8xf32> to vector<1x8x8xf32>
    %33 = vector.shape_cast %32 : vector<1x8x8xf32> to vector<8x8xf32>
    %34 = arith.addf %31, %33 : vector<8x8xf32>
    %cst_19 = arith.constant dense<0xFF800000> : vector<8xf32>
    %35 = vector.multi_reduction <maximumf>, %34, %cst_19 [1] : vector<8x8xf32> to vector<8xf32>
    %36 = vector.shape_cast %35 : vector<8xf32> to vector<8x1xf32>
    %37 = vector.broadcast %36 : vector<8x1xf32> to vector<8x8xf32>
    %38 = arith.subf %34, %37 : vector<8x8xf32>
    %39 = math.exp %38 : vector<8x8xf32>
    %cst_20 = arith.constant dense<0.000000e+00> : vector<8xf32>
    %40 = vector.multi_reduction <add>, %39, %cst_20 [1] : vector<8x8xf32> to vector<8xf32>
    %41 = vector.shape_cast %40 : vector<8xf32> to vector<8x1xf32>
    %42 = tpu.reciprocal %41 {approx = true} : vector<8x1xf32> -> vector<8x1xf32>
    %43 = vector.broadcast %42 : vector<8x1xf32> to vector<8x8xf32>
    %44 = arith.mulf %39, %43 : vector<8x8xf32>
    %45 = vector.extract_strided_slice %28 {offsets = [0, 0], sizes = [8, 8], strides = [1, 1]} : vector<8x32xf32> to vector<8x8xf32>
    %cst_21 = arith.constant dense<0.000000e+00> : vector<8x8xf32>
    %46 = tpu.matmul %44, %45, %cst_21 {dimension_numbers = #tpu.dot_dimension_numbers<[1], [0], [0], [1], [0, 0, 1, 1], [], []>} : vector<8x8xf32>, vector<8x8xf32>, vector<8x8xf32> -> vector<8x8xf32>
    %47 = vector.extract_strided_slice %26 {offsets = [0, 8], sizes = [8, 8], strides = [1, 1]} : vector<8x32xf32> to vector<8x8xf32>
    %48 = vector.extract_strided_slice %27 {offsets = [0, 8], sizes = [8, 8], strides = [1, 1]} : vector<8x32xf32> to vector<8x8xf32>
    %cst_22 = arith.constant dense<0.000000e+00> : vector<8x8xf32>
    %49 = tpu.matmul %47, %48, %cst_22 {dimension_numbers = #tpu.dot_dimension_numbers<[1], [1], [0], [0], [0, 0, 1, 0], [], []>} : vector<8x8xf32>, vector<8x8xf32>, vector<8x8xf32> -> vector<8x8xf32>
    %50 = vector.extract_strided_slice %25 {offsets = [1, 0, 0], sizes = [1, 8, 8], strides = [1, 1, 1]} : vector<4x8x8xf32> to vector<1x8x8xf32>
    %51 = vector.shape_cast %50 : vector<1x8x8xf32> to vector<8x8xf32>
    %52 = arith.addf %49, %51 : vector<8x8xf32>
    %cst_23 = arith.constant dense<0xFF800000> : vector<8xf32>
    %53 = vector.multi_reduction <maximumf>, %52, %cst_23 [1] : vector<8x8xf32> to vector<8xf32>
    %54 = vector.shape_cast %53 : vector<8xf32> to vector<8x1xf32>
    %55 = vector.broadcast %54 : vector<8x1xf32> to vector<8x8xf32>
    %56 = arith.subf %52, %55 : vector<8x8xf32>
    %57 = math.exp %56 : vector<8x8xf32>
    %cst_24 = arith.constant dense<0.000000e+00> : vector<8xf32>
    %58 = vector.multi_reduction <add>, %57, %cst_24 [1] : vector<8x8xf32> to vector<8xf32>
    %59 = vector.shape_cast %58 : vector<8xf32> to vector<8x1xf32>
    %60 = tpu.reciprocal %59 {approx = true} : vector<8x1xf32> -> vector<8x1xf32>
    %61 = vector.broadcast %60 : vector<8x1xf32> to vector<8x8xf32>
    %62 = arith.mulf %57, %61 : vector<8x8xf32>
    %63 = vector.extract_strided_slice %28 {offsets = [0, 8], sizes = [8, 8], strides = [1, 1]} : vector<8x32xf32> to vector<8x8xf32>
    %cst_25 = arith.constant dense<0.000000e+00> : vector<8x8xf32>
    %64 = tpu.matmul %62, %63, %cst_25 {dimension_numbers = #tpu.dot_dimension_numbers<[1], [0], [0], [1], [0, 0, 1, 1], [], []>} : vector<8x8xf32>, vector<8x8xf32>, vector<8x8xf32> -> vector<8x8xf32>
    %65 = vector.extract_strided_slice %26 {offsets = [0, 16], sizes = [8, 8], strides = [1, 1]} : vector<8x32xf32> to vector<8x8xf32>
    %66 = vector.extract_strided_slice %27 {offsets = [0, 16], sizes = [8, 8], strides = [1, 1]} : vector<8x32xf32> to vector<8x8xf32>
    %cst_26 = arith.constant dense<0.000000e+00> : vector<8x8xf32>
    %67 = tpu.matmul %65, %66, %cst_26 {dimension_numbers = #tpu.dot_dimension_numbers<[1], [1], [0], [0], [0, 0, 1, 0], [], []>} : vector<8x8xf32>, vector<8x8xf32>, vector<8x8xf32> -> vector<8x8xf32>
    %68 = vector.extract_strided_slice %25 {offsets = [2, 0, 0], sizes = [1, 8, 8], strides = [1, 1, 1]} : vector<4x8x8xf32> to vector<1x8x8xf32>
    %69 = vector.shape_cast %68 : vector<1x8x8xf32> to vector<8x8xf32>
    %70 = arith.addf %67, %69 : vector<8x8xf32>
    %cst_27 = arith.constant dense<0xFF800000> : vector<8xf32>
    %71 = vector.multi_reduction <maximumf>, %70, %cst_27 [1] : vector<8x8xf32> to vector<8xf32>
    %72 = vector.shape_cast %71 : vector<8xf32> to vector<8x1xf32>
    %73 = vector.broadcast %72 : vector<8x1xf32> to vector<8x8xf32>
    %74 = arith.subf %70, %73 : vector<8x8xf32>
    %75 = math.exp %74 : vector<8x8xf32>
    %cst_28 = arith.constant dense<0.000000e+00> : vector<8xf32>
    %76 = vector.multi_reduction <add>, %75, %cst_28 [1] : vector<8x8xf32> to vector<8xf32>
    %77 = vector.shape_cast %76 : vector<8xf32> to vector<8x1xf32>
    %78 = tpu.reciprocal %77 {approx = true} : vector<8x1xf32> -> vector<8x1xf32>
    %79 = vector.broadcast %78 : vector<8x1xf32> to vector<8x8xf32>
    %80 = arith.mulf %75, %79 : vector<8x8xf32>
    %81 = vector.extract_strided_slice %28 {offsets = [0, 16], sizes = [8, 8], strides = [1, 1]} : vector<8x32xf32> to vector<8x8xf32>
    %cst_29 = arith.constant dense<0.000000e+00> : vector<8x8xf32>
    %82 = tpu.matmul %80, %81, %cst_29 {dimension_numbers = #tpu.dot_dimension_numbers<[1], [0], [0], [1], [0, 0, 1, 1], [], []>} : vector<8x8xf32>, vector<8x8xf32>, vector<8x8xf32> -> vector<8x8xf32>
    %83 = vector.extract_strided_slice %26 {offsets = [0, 24], sizes = [8, 8], strides = [1, 1]} : vector<8x32xf32> to vector<8x8xf32>
    %84 = vector.extract_strided_slice %27 {offsets = [0, 24], sizes = [8, 8], strides = [1, 1]} : vector<8x32xf32> to vector<8x8xf32>
    %cst_30 = arith.constant dense<0.000000e+00> : vector<8x8xf32>
    %85 = tpu.matmul %83, %84, %cst_30 {dimension_numbers = #tpu.dot_dimension_numbers<[1], [1], [0], [0], [0, 0, 1, 0], [], []>} : vector<8x8xf32>, vector<8x8xf32>, vector<8x8xf32> -> vector<8x8xf32>
    %86 = vector.extract_strided_slice %25 {offsets = [3, 0, 0], sizes = [1, 8, 8], strides = [1, 1, 1]} : vector<4x8x8xf32> to vector<1x8x8xf32>
    %87 = vector.shape_cast %86 : vector<1x8x8xf32> to vector<8x8xf32>
    %88 = arith.addf %85, %87 : vector<8x8xf32>
    %cst_31 = arith.constant dense<0xFF800000> : vector<8xf32>
    %89 = vector.multi_reduction <maximumf>, %88, %cst_31 [1] : vector<8x8xf32> to vector<8xf32>
    %90 = vector.shape_cast %89 : vector<8xf32> to vector<8x1xf32>
    %91 = vector.broadcast %90 : vector<8x1xf32> to vector<8x8xf32>
    %92 = arith.subf %88, %91 : vector<8x8xf32>
    %93 = math.exp %92 : vector<8x8xf32>
    %cst_32 = arith.constant dense<0.000000e+00> : vector<8xf32>
    %94 = vector.multi_reduction <add>, %93, %cst_32 [1] : vector<8x8xf32> to vector<8xf32>
    %95 = vector.shape_cast %94 : vector<8xf32> to vector<8x1xf32>
    %96 = tpu.reciprocal %95 {approx = true} : vector<8x1xf32> -> vector<8x1xf32>
    %97 = vector.broadcast %96 : vector<8x1xf32> to vector<8x8xf32>
    %98 = arith.mulf %93, %97 : vector<8x8xf32>
    %99 = vector.extract_strided_slice %28 {offsets = [0, 24], sizes = [8, 8], strides = [1, 1]} : vector<8x32xf32> to vector<8x8xf32>
    %cst_33 = arith.constant dense<0.000000e+00> : vector<8x8xf32>
    %100 = tpu.matmul %98, %99, %cst_33 {dimension_numbers = #tpu.dot_dimension_numbers<[1], [0], [0], [1], [0, 0, 1, 1], [], []>} : vector<8x8xf32>, vector<8x8xf32>, vector<8x8xf32> -> vector<8x8xf32>
    %101 = tpu.concatenate %46, %64, %82, %100 in 1 : vector<8x8xf32>, vector<8x8xf32>, vector<8x8xf32>, vector<8x8xf32> -> vector<8x32xf32>
    %102 = arith.truncf %101 : vector<8x32xf32> to vector<8x32xbf16>
    %c0_34 = arith.constant 0 : index
    %c0_35 = arith.constant 0 : index
    %103 = vector.load %arg5[%c0_34, %c0_35] : memref<32x32xbf16, #tpu.memory_space<vmem>>, vector<32x32xbf16>
    %cst_36 = arith.constant dense<0.000000e+00> : vector<8x32xf32>
    %104 = tpu.matmul %102, %103, %cst_36 {dimension_numbers = #tpu.dot_dimension_numbers<[1], [0], [0], [1], [0, 0, 1, 1], [], []>} : vector<8x32xbf16>, vector<32x32xbf16>, vector<8x32xf32> -> vector<8x32xf32>
    %105 = arith.addf %1, %104 : vector<8x32xf32>
    %c0_37 = arith.constant 0 : index
    %c0_38 = arith.constant 0 : index
    %106 = vector.load %arg6[%c0_37, %c0_38] : memref<1x32xf32, #tpu.memory_space<vmem>>, vector<1x32xf32>
    %107 = arith.mulf %105, %105 : vector<8x32xf32>
    %cst_39 = arith.constant dense<0.000000e+00> : vector<8xf32>
    %108 = vector.multi_reduction <add>, %107, %cst_39 [1] : vector<8x32xf32> to vector<8xf32>
    %109 = vector.shape_cast %108 : vector<8xf32> to vector<8x1xf32>
    %cst_40 = arith.constant 3.200000e+01 : f32
    %110 = vector.broadcast %cst_40 : f32 to vector<8x1xf32>
    %111 = arith.divf %109, %110 : vector<8x1xf32>
    %cst_41 = arith.constant 9.99999997E-7 : f32
    %112 = vector.broadcast %cst_41 : f32 to vector<8x1xf32>
    %113 = arith.addf %111, %112 : vector<8x1xf32>
    %114 = math.rsqrt %113 : vector<8x1xf32>
    %115 = vector.broadcast %114 : vector<8x1xf32> to vector<8x32xf32>
    %116 = arith.mulf %105, %115 : vector<8x32xf32>
    %117 = vector.broadcast %106 : vector<1x32xf32> to vector<8x32xf32>
    %118 = arith.mulf %116, %117 : vector<8x32xf32>
    %119 = arith.truncf %118 : vector<8x32xf32> to vector<8x32xbf16>
    %c0_42 = arith.constant 0 : index
    %c0_43 = arith.constant 0 : index
    %120 = vector.load %arg7[%c0_42, %c0_43] : memref<32x32xbf16, #tpu.memory_space<vmem>>, vector<32x32xbf16>
    %cst_44 = arith.constant dense<0.000000e+00> : vector<8x32xf32>
    %121 = tpu.matmul %119, %120, %cst_44 {dimension_numbers = #tpu.dot_dimension_numbers<[1], [0], [0], [1], [0, 0, 1, 1], [], []>} : vector<8x32xbf16>, vector<32x32xbf16>, vector<8x32xf32> -> vector<8x32xf32>
    %122 = arith.truncf %3 : vector<8x32xf32> to vector<8x32xbf16>
    %c0_45 = arith.constant 0 : index
    %c0_46 = arith.constant 0 : index
    %123 = vector.load %arg8[%c0_45, %c0_46] : memref<32x64xbf16, #tpu.memory_space<vmem>>, vector<32x64xbf16>
    %cst_47 = arith.constant dense<0.000000e+00> : vector<8x64xf32>
    %124 = tpu.matmul %122, %123, %cst_47 {dimension_numbers = #tpu.dot_dimension_numbers<[1], [0], [0], [1], [0, 0, 1, 1], [], []>} : vector<8x32xbf16>, vector<32x64xbf16>, vector<8x64xf32> -> vector<8x64xf32>
    %c0_48 = arith.constant 0 : index
    %c0_49 = arith.constant 0 : index
    %c0_50 = arith.constant 0 : index
    %125 = vector.load %arg15[%c0_48, %c0_49, %c0_50] : memref<1x1x8xf32, #tpu.memory_space<vmem>>, vector<1x1x8xf32>
    %126 = vector.shape_cast %125 : vector<1x1x8xf32> to vector<1x8xf32>
    %127 = vector.shape_cast %126 : vector<1x8xf32> to vector<1x1x8xf32>
    %128 = vector.broadcast %127 : vector<1x1x8xf32> to vector<4x8x8xf32>
    %129 = vector.extract_strided_slice %124 {offsets = [0, 0], sizes = [8, 32], strides = [1, 1]} : vector<8x64xf32> to vector<8x32xf32>
    %130 = vector.extract_strided_slice %124 {offsets = [0, 32], sizes = [8, 32], strides = [1, 1]} : vector<8x64xf32> to vector<8x32xf32>
    %131 = vector.extract_strided_slice %121 {offsets = [0, 0], sizes = [8, 8], strides = [1, 1]} : vector<8x32xf32> to vector<8x8xf32>
    %132 = vector.extract_strided_slice %129 {offsets = [0, 0], sizes = [8, 8], strides = [1, 1]} : vector<8x32xf32> to vector<8x8xf32>
    %cst_51 = arith.constant dense<0.000000e+00> : vector<8x8xf32>
    %133 = tpu.matmul %131, %132, %cst_51 {dimension_numbers = #tpu.dot_dimension_numbers<[1], [1], [0], [0], [0, 0, 1, 0], [], []>} : vector<8x8xf32>, vector<8x8xf32>, vector<8x8xf32> -> vector<8x8xf32>
    %134 = vector.extract_strided_slice %128 {offsets = [0, 0, 0], sizes = [1, 8, 8], strides = [1, 1, 1]} : vector<4x8x8xf32> to vector<1x8x8xf32>
    %135 = vector.shape_cast %134 : vector<1x8x8xf32> to vector<8x8xf32>
    %136 = arith.addf %133, %135 : vector<8x8xf32>
    %cst_52 = arith.constant dense<0xFF800000> : vector<8xf32>
    %137 = vector.multi_reduction <maximumf>, %136, %cst_52 [1] : vector<8x8xf32> to vector<8xf32>
    %138 = vector.shape_cast %137 : vector<8xf32> to vector<8x1xf32>
    %139 = vector.broadcast %138 : vector<8x1xf32> to vector<8x8xf32>
    %140 = arith.subf %136, %139 : vector<8x8xf32>
    %141 = math.exp %140 : vector<8x8xf32>
    %cst_53 = arith.constant dense<0.000000e+00> : vector<8xf32>
    %142 = vector.multi_reduction <add>, %141, %cst_53 [1] : vector<8x8xf32> to vector<8xf32>
    %143 = vector.shape_cast %142 : vector<8xf32> to vector<8x1xf32>
    %144 = tpu.reciprocal %143 {approx = true} : vector<8x1xf32> -> vector<8x1xf32>
    %145 = vector.broadcast %144 : vector<8x1xf32> to vector<8x8xf32>
    %146 = arith.mulf %141, %145 : vector<8x8xf32>
    %147 = vector.extract_strided_slice %130 {offsets = [0, 0], sizes = [8, 8], strides = [1, 1]} : vector<8x32xf32> to vector<8x8xf32>
    %cst_54 = arith.constant dense<0.000000e+00> : vector<8x8xf32>
    %148 = tpu.matmul %146, %147, %cst_54 {dimension_numbers = #tpu.dot_dimension_numbers<[1], [0], [0], [1], [0, 0, 1, 1], [], []>} : vector<8x8xf32>, vector<8x8xf32>, vector<8x8xf32> -> vector<8x8xf32>
    %149 = vector.extract_strided_slice %121 {offsets = [0, 8], sizes = [8, 8], strides = [1, 1]} : vector<8x32xf32> to vector<8x8xf32>
    %150 = vector.extract_strided_slice %129 {offsets = [0, 8], sizes = [8, 8], strides = [1, 1]} : vector<8x32xf32> to vector<8x8xf32>
    %cst_55 = arith.constant dense<0.000000e+00> : vector<8x8xf32>
    %151 = tpu.matmul %149, %150, %cst_55 {dimension_numbers = #tpu.dot_dimension_numbers<[1], [1], [0], [0], [0, 0, 1, 0], [], []>} : vector<8x8xf32>, vector<8x8xf32>, vector<8x8xf32> -> vector<8x8xf32>
    %152 = vector.extract_strided_slice %128 {offsets = [1, 0, 0], sizes = [1, 8, 8], strides = [1, 1, 1]} : vector<4x8x8xf32> to vector<1x8x8xf32>
    %153 = vector.shape_cast %152 : vector<1x8x8xf32> to vector<8x8xf32>
    %154 = arith.addf %151, %153 : vector<8x8xf32>
    %cst_56 = arith.constant dense<0xFF800000> : vector<8xf32>
    %155 = vector.multi_reduction <maximumf>, %154, %cst_56 [1] : vector<8x8xf32> to vector<8xf32>
    %156 = vector.shape_cast %155 : vector<8xf32> to vector<8x1xf32>
    %157 = vector.broadcast %156 : vector<8x1xf32> to vector<8x8xf32>
    %158 = arith.subf %154, %157 : vector<8x8xf32>
    %159 = math.exp %158 : vector<8x8xf32>
    %cst_57 = arith.constant dense<0.000000e+00> : vector<8xf32>
    %160 = vector.multi_reduction <add>, %159, %cst_57 [1] : vector<8x8xf32> to vector<8xf32>
    %161 = vector.shape_cast %160 : vector<8xf32> to vector<8x1xf32>
    %162 = tpu.reciprocal %161 {approx = true} : vector<8x1xf32> -> vector<8x1xf32>
    %163 = vector.broadcast %162 : vector<8x1xf32> to vector<8x8xf32>
    %164 = arith.mulf %159, %163 : vector<8x8xf32>
    %165 = vector.extract_strided_slice %130 {offsets = [0, 8], sizes = [8, 8], strides = [1, 1]} : vector<8x32xf32> to vector<8x8xf32>
    %cst_58 = arith.constant dense<0.000000e+00> : vector<8x8xf32>
    %166 = tpu.matmul %164, %165, %cst_58 {dimension_numbers = #tpu.dot_dimension_numbers<[1], [0], [0], [1], [0, 0, 1, 1], [], []>} : vector<8x8xf32>, vector<8x8xf32>, vector<8x8xf32> -> vector<8x8xf32>
    %167 = vector.extract_strided_slice %121 {offsets = [0, 16], sizes = [8, 8], strides = [1, 1]} : vector<8x32xf32> to vector<8x8xf32>
    %168 = vector.extract_strided_slice %129 {offsets = [0, 16], sizes = [8, 8], strides = [1, 1]} : vector<8x32xf32> to vector<8x8xf32>
    %cst_59 = arith.constant dense<0.000000e+00> : vector<8x8xf32>
    %169 = tpu.matmul %167, %168, %cst_59 {dimension_numbers = #tpu.dot_dimension_numbers<[1], [1], [0], [0], [0, 0, 1, 0], [], []>} : vector<8x8xf32>, vector<8x8xf32>, vector<8x8xf32> -> vector<8x8xf32>
    %170 = vector.extract_strided_slice %128 {offsets = [2, 0, 0], sizes = [1, 8, 8], strides = [1, 1, 1]} : vector<4x8x8xf32> to vector<1x8x8xf32>
    %171 = vector.shape_cast %170 : vector<1x8x8xf32> to vector<8x8xf32>
    %172 = arith.addf %169, %171 : vector<8x8xf32>
    %cst_60 = arith.constant dense<0xFF800000> : vector<8xf32>
    %173 = vector.multi_reduction <maximumf>, %172, %cst_60 [1] : vector<8x8xf32> to vector<8xf32>
    %174 = vector.shape_cast %173 : vector<8xf32> to vector<8x1xf32>
    %175 = vector.broadcast %174 : vector<8x1xf32> to vector<8x8xf32>
    %176 = arith.subf %172, %175 : vector<8x8xf32>
    %177 = math.exp %176 : vector<8x8xf32>
    %cst_61 = arith.constant dense<0.000000e+00> : vector<8xf32>
    %178 = vector.multi_reduction <add>, %177, %cst_61 [1] : vector<8x8xf32> to vector<8xf32>
    %179 = vector.shape_cast %178 : vector<8xf32> to vector<8x1xf32>
    %180 = tpu.reciprocal %179 {approx = true} : vector<8x1xf32> -> vector<8x1xf32>
    %181 = vector.broadcast %180 : vector<8x1xf32> to vector<8x8xf32>
    %182 = arith.mulf %177, %181 : vector<8x8xf32>
    %183 = vector.extract_strided_slice %130 {offsets = [0, 16], sizes = [8, 8], strides = [1, 1]} : vector<8x32xf32> to vector<8x8xf32>
    %cst_62 = arith.constant dense<0.000000e+00> : vector<8x8xf32>
    %184 = tpu.matmul %182, %183, %cst_62 {dimension_numbers = #tpu.dot_dimension_numbers<[1], [0], [0], [1], [0, 0, 1, 1], [], []>} : vector<8x8xf32>, vector<8x8xf32>, vector<8x8xf32> -> vector<8x8xf32>
    %185 = vector.extract_strided_slice %121 {offsets = [0, 24], sizes = [8, 8], strides = [1, 1]} : vector<8x32xf32> to vector<8x8xf32>
    %186 = vector.extract_strided_slice %129 {offsets = [0, 24], sizes = [8, 8], strides = [1, 1]} : vector<8x32xf32> to vector<8x8xf32>
    %cst_63 = arith.constant dense<0.000000e+00> : vector<8x8xf32>
    %187 = tpu.matmul %185, %186, %cst_63 {dimension_numbers = #tpu.dot_dimension_numbers<[1], [1], [0], [0], [0, 0, 1, 0], [], []>} : vector<8x8xf32>, vector<8x8xf32>, vector<8x8xf32> -> vector<8x8xf32>
    %188 = vector.extract_strided_slice %128 {offsets = [3, 0, 0], sizes = [1, 8, 8], strides = [1, 1, 1]} : vector<4x8x8xf32> to vector<1x8x8xf32>
    %189 = vector.shape_cast %188 : vector<1x8x8xf32> to vector<8x8xf32>
    %190 = arith.addf %187, %189 : vector<8x8xf32>
    %cst_64 = arith.constant dense<0xFF800000> : vector<8xf32>
    %191 = vector.multi_reduction <maximumf>, %190, %cst_64 [1] : vector<8x8xf32> to vector<8xf32>
    %192 = vector.shape_cast %191 : vector<8xf32> to vector<8x1xf32>
    %193 = vector.broadcast %192 : vector<8x1xf32> to vector<8x8xf32>
    %194 = arith.subf %190, %193 : vector<8x8xf32>
    %195 = math.exp %194 : vector<8x8xf32>
    %cst_65 = arith.constant dense<0.000000e+00> : vector<8xf32>
    %196 = vector.multi_reduction <add>, %195, %cst_65 [1] : vector<8x8xf32> to vector<8xf32>
    %197 = vector.shape_cast %196 : vector<8xf32> to vector<8x1xf32>
    %198 = tpu.reciprocal %197 {approx = true} : vector<8x1xf32> -> vector<8x1xf32>
    %199 = vector.broadcast %198 : vector<8x1xf32> to vector<8x8xf32>
    %200 = arith.mulf %195, %199 : vector<8x8xf32>
    %201 = vector.extract_strided_slice %130 {offsets = [0, 24], sizes = [8, 8], strides = [1, 1]} : vector<8x32xf32> to vector<8x8xf32>
    %cst_66 = arith.constant dense<0.000000e+00> : vector<8x8xf32>
    %202 = tpu.matmul %200, %201, %cst_66 {dimension_numbers = #tpu.dot_dimension_numbers<[1], [0], [0], [1], [0, 0, 1, 1], [], []>} : vector<8x8xf32>, vector<8x8xf32>, vector<8x8xf32> -> vector<8x8xf32>
    %203 = tpu.concatenate %148, %166, %184, %202 in 1 : vector<8x8xf32>, vector<8x8xf32>, vector<8x8xf32>, vector<8x8xf32> -> vector<8x32xf32>
    %204 = arith.truncf %203 : vector<8x32xf32> to vector<8x32xbf16>
    %c0_67 = arith.constant 0 : index
    %c0_68 = arith.constant 0 : index
    %205 = vector.load %arg9[%c0_67, %c0_68] : memref<32x32xbf16, #tpu.memory_space<vmem>>, vector<32x32xbf16>
    %cst_69 = arith.constant dense<0.000000e+00> : vector<8x32xf32>
    %206 = tpu.matmul %204, %205, %cst_69 {dimension_numbers = #tpu.dot_dimension_numbers<[1], [0], [0], [1], [0, 0, 1, 1], [], []>} : vector<8x32xbf16>, vector<32x32xbf16>, vector<8x32xf32> -> vector<8x32xf32>
    %207 = arith.addf %105, %206 : vector<8x32xf32>
    %c0_70 = arith.constant 0 : index
    %c0_71 = arith.constant 0 : index
    %208 = vector.load %arg10[%c0_70, %c0_71] : memref<1x32xf32, #tpu.memory_space<vmem>>, vector<1x32xf32>
    %209 = arith.mulf %207, %207 : vector<8x32xf32>
    %cst_72 = arith.constant dense<0.000000e+00> : vector<8xf32>
    %210 = vector.multi_reduction <add>, %209, %cst_72 [1] : vector<8x32xf32> to vector<8xf32>
    %211 = vector.shape_cast %210 : vector<8xf32> to vector<8x1xf32>
    %cst_73 = arith.constant 3.200000e+01 : f32
    %212 = vector.broadcast %cst_73 : f32 to vector<8x1xf32>
    %213 = arith.divf %211, %212 : vector<8x1xf32>
    %cst_74 = arith.constant 9.99999997E-7 : f32
    %214 = vector.broadcast %cst_74 : f32 to vector<8x1xf32>
    %215 = arith.addf %213, %214 : vector<8x1xf32>
    %216 = math.rsqrt %215 : vector<8x1xf32>
    %217 = vector.broadcast %216 : vector<8x1xf32> to vector<8x32xf32>
    %218 = arith.mulf %207, %217 : vector<8x32xf32>
    %219 = vector.broadcast %208 : vector<1x32xf32> to vector<8x32xf32>
    %220 = arith.mulf %218, %219 : vector<8x32xf32>
    %221 = arith.truncf %220 : vector<8x32xf32> to vector<8x32xbf16>
    %c0_75 = arith.constant 0 : index
    %c0_76 = arith.constant 0 : index
    %222 = vector.load %arg11[%c0_75, %c0_76] : memref<32x64xbf16, #tpu.memory_space<vmem>>, vector<32x64xbf16>
    %cst_77 = arith.constant dense<0.000000e+00> : vector<8x64xf32>
    %223 = tpu.matmul %221, %222, %cst_77 {dimension_numbers = #tpu.dot_dimension_numbers<[1], [0], [0], [1], [0, 0, 1, 1], [], []>} : vector<8x32xbf16>, vector<32x64xbf16>, vector<8x64xf32> -> vector<8x64xf32>
    %cst_78 = arith.constant 0.000000e+00 : f32
    %224 = vector.broadcast %cst_78 : f32 to vector<8x64xf32>
    %225 = arith.maximumf %223, %224 : vector<8x64xf32>
    %226 = arith.truncf %225 : vector<8x64xf32> to vector<8x64xbf16>
    %c0_79 = arith.constant 0 : index
    %c0_80 = arith.constant 0 : index
    %227 = vector.load %arg12[%c0_79, %c0_80] : memref<64x32xbf16, #tpu.memory_space<vmem>>, vector<64x32xbf16>
    %cst_81 = arith.constant dense<0.000000e+00> : vector<8x32xf32>
    %228 = tpu.matmul %226, %227, %cst_81 {dimension_numbers = #tpu.dot_dimension_numbers<[1], [0], [0], [1], [0, 0, 1, 1], [], []>} : vector<8x64xbf16>, vector<64x32xbf16>, vector<8x32xf32> -> vector<8x32xf32>
    %229 = arith.addf %207, %228 : vector<8x32xf32>
    %c0_82 = arith.constant 0 : index
    %c0_83 = arith.constant 0 : index
    %c0_84 = arith.constant 0 : index
    %230 = vector.load %arg16[%c0_82, %c0_83, %c0_84] : memref<1x8x32xf32, #tpu.memory_space<vmem>>, vector<1x8x32xf32>
    %231 = vector.shape_cast %230 : vector<1x8x32xf32> to vector<8x32xf32>
    %232 = vector.shape_cast %229 : vector<8x32xf32> to vector<1x8x32xf32>
    tpu.vector_store %arg16[%c0_82, %c0_83, %c0_84], %232 {strides = array<i32>} : memref<1x8x32xf32, #tpu.memory_space<vmem>>, vector<1x8x32xf32>,
    return
  }
  func.func @transform_0(%arg0: i32) -> (i32, i32, i32) {
    %c0_i32 = arith.constant 0 : i32
    %c0_i32_0 = arith.constant 0 : i32
    %c0_i32_1 = arith.constant 0 : i32
    return %arg0, %c0_i32, %c0_i32_0 : i32, i32, i32
  }
  func.func @transform_1(%arg0: i32) -> (i32, i32, i32) {
    %c0_i32 = arith.constant 0 : i32
    %c0_i32_0 = arith.constant 0 : i32
    %c0_i32_1 = arith.constant 0 : i32
    return %arg0, %c0_i32, %c0_i32_0 : i32, i32, i32
  }
  func.func @transform_2(%arg0: i32) -> (i32, i32) {
    %c0_i32 = arith.constant 0 : i32
    %c0_i32_0 = arith.constant 0 : i32
    %c0_i32_1 = arith.constant 0 : i32
    return %c0_i32, %c0_i32_0 : i32, i32
  }
  func.func @transform_3(%arg0: i32) -> (i32, i32) {
    %c0_i32 = arith.constant 0 : i32
    %c0_i32_0 = arith.constant 0 : i32
    %c0_i32_1 = arith.constant 0 : i32
    return %c0_i32, %c0_i32_0 : i32, i32
  }
  func.func @transform_4(%arg0: i32) -> (i32, i32) {
    %c0_i32 = arith.constant 0 : i32
    %c0_i32_0 = arith.constant 0 : i32
    %c0_i32_1 = arith.constant 0 : i32
    return %c0_i32, %c0_i32_0 : i32, i32
  }
  func.func @transform_5(%arg0: i32) -> (i32, i32) {
    %c0_i32 = arith.constant 0 : i32
    %c0_i32_0 = arith.constant 0 : i32
    %c0_i32_1 = arith.constant 0 : i32
    return %c0_i32, %c0_i32_0 : i32, i32
  }
  func.func @transform_6(%arg0: i32) -> (i32, i32) {
    %c0_i32 = arith.constant 0 : i32
    %c0_i32_0 = arith.constant 0 : i32
    %c0_i32_1 = arith.constant 0 : i32
    return %c0_i32, %c0_i32_0 : i32, i32
  }
  func.func @transform_7(%arg0: i32) -> (i32, i32) {
    %c0_i32 = arith.constant 0 : i32
    %c0_i32_0 = arith.constant 0 : i32
    %c0_i32_1 = arith.constant 0 : i32
    return %c0_i32, %c0_i32_0 : i32, i32
  }
  func.func @transform_8(%arg0: i32) -> (i32, i32) {
    %c0_i32 = arith.constant 0 : i32
    %c0_i32_0 = arith.constant 0 : i32
    %c0_i32_1 = arith.constant 0 : i32
    return %c0_i32, %c0_i32_0 : i32, i32
  }
  func.func @transform_9(%arg0: i32) -> (i32, i32) {
    %c0_i32 = arith.constant 0 : i32
    %c0_i32_0 = arith.constant 0 : i32
    %c0_i32_1 = arith.constant 0 : i32
    return %c0_i32, %c0_i32_0 : i32, i32
  }
  func.func @transform_10(%arg0: i32) -> (i32, i32) {
    %c0_i32 = arith.constant 0 : i32
    %c0_i32_0 = arith.constant 0 : i32
    %c0_i32_1 = arith.constant 0 : i32
    return %c0_i32, %c0_i32_0 : i32, i32
  }
  func.func @transform_11(%arg0: i32) -> (i32, i32) {
    %c0_i32 = arith.constant 0 : i32
    %c0_i32_0 = arith.constant 0 : i32
    %c0_i32_1 = arith.constant 0 : i32
    return %c0_i32, %c0_i32_0 : i32, i32
  }
  func.func @transform_12(%arg0: i32) -> (i32, i32, i32) {
    %c0_i32 = arith.constant 0 : i32
    %c0_i32_0 = arith.constant 0 : i32
    %c0_i32_1 = arith.constant 0 : i32
    %c0_i32_2 = arith.constant 0 : i32
    return %c0_i32, %c0_i32_0, %c0_i32_1 : i32, i32, i32
  }
  func.func @transform_13(%arg0: i32) -> (i32, i32, i32) {
    %c0_i32 = arith.constant 0 : i32
    %c0_i32_0 = arith.constant 0 : i32
    %c0_i32_1 = arith.constant 0 : i32
    return %arg0, %c0_i32, %c0_i32_0 : i32, i32, i32
  }
  func.func @transform_14(%arg0: i32) -> (i32, i32, i32) {
    %c0_i32 = arith.constant 0 : i32
    %c0_i32_0 = arith.constant 0 : i32
    %c0_i32_1 = arith.constant 0 : i32
    return %arg0, %c0_i32, %c0_i32_0 : i32, i32, i32
  }
  func.func @transform_15(%arg0: i32) -> (i32, i32, i32) {
    %c0_i32 = arith.constant 0 : i32
    %c0_i32_0 = arith.constant 0 : i32
    %c0_i32_1 = arith.constant 0 : i32
    return %arg0, %c0_i32, %c0_i32_0 : i32, i32, i32
  }
}

module attributes {stable_mosaic.version = 11 : i64} {
  func.func @_lm_head_xent_kernel(%arg0: i32, %arg1: memref<1x8x32xf32, #tpu.memory_space<vmem>>, %arg2: memref<1x32xf32, #tpu.memory_space<vmem>>, %arg3: memref<32x128xbf16, #tpu.memory_space<vmem>>, %arg4: memref<1x8x1xi32, #tpu.memory_space<vmem>>, %arg5: memref<1x8x128xf32, #tpu.memory_space<vmem>>, %arg6: memref<1x8x1xf32, #tpu.memory_space<vmem>>) attributes {dimension_semantics = [#tpu.dimension_semantics<parallel>], iteration_bounds = array<i64: 2>, scalar_prefetch = 0 : i64, scratch_operands = 0 : i64, tpu.core_type = #tpu.core_type<tc>, window_params = [{transform_indices = @transform_0, window_bounds = array<i64: 1, 8, 32>}, {pipeline_mode = #tpu.pipeline_mode<synchronous>, transform_indices = @transform_1, window_bounds = array<i64: 1, 32>}, {pipeline_mode = #tpu.pipeline_mode<synchronous>, transform_indices = @transform_2, window_bounds = array<i64: 32, 128>}, {transform_indices = @transform_3, window_bounds = array<i64: 1, 8, 1>}, {transform_indices = @transform_4, window_bounds = array<i64: 1, 8, 128>}, {transform_indices = @transform_5, window_bounds = array<i64: 1, 8, 1>}]} {
    %c0 = arith.constant 0 : index
    %c0_0 = arith.constant 0 : index
    %c0_1 = arith.constant 0 : index
    %0 = vector.load %arg1[%c0, %c0_0, %c0_1] : memref<1x8x32xf32, #tpu.memory_space<vmem>>, vector<1x8x32xf32>
    %1 = vector.shape_cast %0 : vector<1x8x32xf32> to vector<8x32xf32>
    %c0_2 = arith.constant 0 : index
    %c0_3 = arith.constant 0 : index
    %2 = vector.load %arg2[%c0_2, %c0_3] : memref<1x32xf32, #tpu.memory_space<vmem>>, vector<1x32xf32>
    %3 = arith.mulf %1, %1 : vector<8x32xf32>
    %cst = arith.constant dense<0.000000e+00> : vector<8xf32>
    %4 = vector.multi_reduction <add>, %3, %cst [1] : vector<8x32xf32> to vector<8xf32>
    %5 = vector.shape_cast %4 : vector<8xf32> to vector<8x1xf32>
    %cst_4 = arith.constant 3.200000e+01 : f32
    %6 = vector.broadcast %cst_4 : f32 to vector<8x1xf32>
    %7 = arith.divf %5, %6 : vector<8x1xf32>
    %cst_5 = arith.constant 9.99999997E-7 : f32
    %8 = vector.broadcast %cst_5 : f32 to vector<8x1xf32>
    %9 = arith.addf %7, %8 : vector<8x1xf32>
    %10 = math.rsqrt %9 : vector<8x1xf32>
    %11 = vector.broadcast %10 : vector<8x1xf32> to vector<8x32xf32>
    %12 = arith.mulf %1, %11 : vector<8x32xf32>
    %13 = vector.broadcast %2 : vector<1x32xf32> to vector<8x32xf32>
    %14 = arith.mulf %12, %13 : vector<8x32xf32>
    %cst_6 = arith.constant 0.176776692 : f32
    %15 = vector.broadcast %cst_6 : f32 to vector<8x32xf32>
    %16 = arith.mulf %14, %15 : vector<8x32xf32>
    %17 = arith.truncf %16 : vector<8x32xf32> to vector<8x32xbf16>
    %c0_7 = arith.constant 0 : index
    %c0_8 = arith.constant 0 : index
    %18 = vector.load %arg3[%c0_7, %c0_8] : memref<32x128xbf16, #tpu.memory_space<vmem>>, vector<32x128xbf16>
    %cst_9 = arith.constant dense<0.000000e+00> : vector<8x128xf32>
    %19 = tpu.matmul %17, %18, %cst_9 {dimension_numbers = #tpu.dot_dimension_numbers<[1], [0], [0], [1], [0, 0, 1, 1], [], []>} : vector<8x32xbf16>, vector<32x128xbf16>, vector<8x128xf32> -> vector<8x128xf32>
    %c0_10 = arith.constant 0 : index
    %c0_11 = arith.constant 0 : index
    %c0_12 = arith.constant 0 : index
    %20 = vector.load %arg5[%c0_10, %c0_11, %c0_12] : memref<1x8x128xf32, #tpu.memory_space<vmem>>, vector<1x8x128xf32>
    %21 = vector.shape_cast %20 : vector<1x8x128xf32> to vector<8x128xf32>
    %22 = vector.shape_cast %19 : vector<8x128xf32> to vector<1x8x128xf32>
    tpu.vector_store %arg5[%c0_10, %c0_11, %c0_12], %22 {strides = array<i32>} : memref<1x8x128xf32, #tpu.memory_space<vmem>>, vector<1x8x128xf32>,
    %c0_13 = arith.constant 0 : index
    %c0_14 = arith.constant 0 : index
    %c0_15 = arith.constant 0 : index
    %23 = vector.load %arg4[%c0_13, %c0_14, %c0_15] : memref<1x8x1xi32, #tpu.memory_space<vmem>>, vector<1x8x1xi32>
    %24 = vector.shape_cast %23 : vector<1x8x1xi32> to vector<8x1xi32>
    %cst_16 = arith.constant dense<0xFF800000> : vector<8xf32>
    %25 = vector.multi_reduction <maximumf>, %19, %cst_16 [1] : vector<8x128xf32> to vector<8xf32>
    %26 = vector.shape_cast %25 : vector<8xf32> to vector<8x1xf32>
    %27 = vector.broadcast %26 : vector<8x1xf32> to vector<8x128xf32>
    %28 = arith.subf %19, %27 : vector<8x128xf32>
    %29 = math.exp %28 : vector<8x128xf32>
    %cst_17 = arith.constant dense<0.000000e+00> : vector<8xf32>
    %30 = vector.multi_reduction <add>, %29, %cst_17 [1] : vector<8x128xf32> to vector<8xf32>
    %31 = vector.shape_cast %30 : vector<8xf32> to vector<8x1xf32>
    %32 = math.log %31 : vector<8x1xf32>
    %33 = arith.addf %32, %26 : vector<8x1xf32>
    %34 = tpu.iota {dimensions = array<i32: 1>} : vector<8x128xi32>
    %35 = vector.broadcast %24 : vector<8x1xi32> to vector<8x128xi32>
    %36 = arith.cmpi eq, %34, %35 : vector<8x128xi32>
    %cst_18 = arith.constant 0.000000e+00 : f32
    %37 = vector.broadcast %cst_18 : f32 to vector<8x128xf32>
    %38 = arith.select %36, %19, %37 : vector<8x128xi1>, vector<8x128xf32>
    %cst_19 = arith.constant dense<0.000000e+00> : vector<8xf32>
    %39 = vector.multi_reduction <add>, %38, %cst_19 [1] : vector<8x128xf32> to vector<8xf32>
    %40 = vector.shape_cast %39 : vector<8xf32> to vector<8x1xf32>
    %41 = arith.subf %33, %40 : vector<8x1xf32>
    %c0_20 = arith.constant 0 : index
    %c0_21 = arith.constant 0 : index
    %c0_22 = arith.constant 0 : index
    %42 = vector.load %arg6[%c0_20, %c0_21, %c0_22] : memref<1x8x1xf32, #tpu.memory_space<vmem>>, vector<1x8x1xf32>
    %43 = vector.shape_cast %42 : vector<1x8x1xf32> to vector<8x1xf32>
    %44 = vector.shape_cast %41 : vector<8x1xf32> to vector<1x8x1xf32>
    tpu.vector_store %arg6[%c0_20, %c0_21, %c0_22], %44 {strides = array<i32>} : memref<1x8x1xf32, #tpu.memory_space<vmem>>, vector<1x8x1xf32>,
    return
  }
  func.func @transform_0(%arg0: i32) -> (i32, i32, i32) {
    %c0_i32 = arith.constant 0 : i32
    %c0_i32_0 = arith.constant 0 : i32
    %c0_i32_1 = arith.constant 0 : i32
    return %arg0, %c0_i32, %c0_i32_0 : i32, i32, i32
  }
  func.func @transform_1(%arg0: i32) -> (i32, i32) {
    %c0_i32 = arith.constant 0 : i32
    %c0_i32_0 = arith.constant 0 : i32
    %c0_i32_1 = arith.constant 0 : i32
    return %c0_i32, %c0_i32_0 : i32, i32
  }
  func.func @transform_2(%arg0: i32) -> (i32, i32) {
    %c0_i32 = arith.constant 0 : i32
    %c0_i32_0 = arith.constant 0 : i32
    %c0_i32_1 = arith.constant 0 : i32
    return %c0_i32, %c0_i32_0 : i32, i32
  }
  func.func @transform_3(%arg0: i32) -> (i32, i32, i32) {
    %c0_i32 = arith.constant 0 : i32
    %c0_i32_0 = arith.constant 0 : i32
    %c0_i32_1 = arith.constant 0 : i32
    return %arg0, %c0_i32, %c0_i32_0 : i32, i32, i32
  }
  func.func @transform_4(%arg0: i32) -> (i32, i32, i32) {
    %c0_i32 = arith.constant 0 : i32
    %c0_i32_0 = arith.constant 0 : i32
    %c0_i32_1 = arith.constant 0 : i32
    return %arg0, %c0_i32, %c0_i32_0 : i32, i32, i32
  }
  func.func @transform_5(%arg0: i32) -> (i32, i32, i32) {
    %c0_i32 = arith.constant 0 : i32
    %c0_i32_0 = arith.constant 0 : i32
    %c0_i32_1 = arith.constant 0 : i32
    return %arg0, %c0_i32, %c0_i32_0 : i32, i32, i32
  }
}

</mosaic_0001>

<bundles_post_ra>
// kernel: _forward.8
= control target key start
LH: loop header
LB: loop body
LE: loop exit
PB: predicated region body
PF: predicated region fallthrough
CT: control target
= control target key end

     0   :  { %vm16_vm0 = vcmask 261120   ;;  %v75_v6 = vmov 32.0   ;;  %s110_s0 = inlined_call_operand.vmem [shape: f32[2,8,32], index: 0, kind: input, shape index: {}]   ;;  %s111_s1 = inlined_call_operand.vmem [shape: f32[1,32], index: 1, kind: input, shape index: {}]   ;;  %s112_s2 = inlined_call_operand.vmem [shape: f32[2,8,32], index: 2, kind: output, shape index: {}]  }
   0x1   :  { %v11_v0 = vld [vmem:[%s110_s0] sm:$0xff]  ;;  %v12_v2 = vld [vmem:[%s110_s0 + $0x8] sm:$0xff]  ;;  %69 = vrcp.f32 %v75_v6 }
   0x2   :  { %v14_v1 = vmul.f32 %v11_v0, %v11_v0  ;;  %v15_v4 = vmul.f32 %v12_v2, %v12_v2  ;;  %v68_v27 = vld [vmem:[%s111_s1] ss:$0 sm:$0xff] }
   0x4   :  { %v17_v3 = vsel %vm16_vm0, %v14_v1, 0.0  ;;  %v20_v5 = vsel %vm16_vm0, %v15_v4, 0.0 }
   0x5   :  { %18 = vadd.xlane.f32.xlu0 %v17_v3 }
   0x7   :  { %v70_v7 = vpop.eup %69 }
   0x8   :  { %v24_v8 = vmul.f32 32.0, %v70_v7  ;;  %vm28_vm1 = vweird.f32 %v70_v7 }
   0xa   :  { %v25_v9 = vsub.f32 1.0, %v24_v8 }
   0xc   :  { %v26_v10 = vmul.f32 %v70_v7, %v25_v9 }
   0xd   :  { %21 = vadd.xlane.f32.xlu0 %v20_v5 }
   0xe   :  { %v27_v11 = vadd.f32 %v70_v7, %v26_v10 }
  0x10   :  { %v29_v12 = vsel %vm28_vm1, %v70_v7, %v27_v11 }
  0x78   :  { %v19_v13 = vpop.xlane.xlu0 %18 }
  0x79   :  { %v30_v14 = vmul.f32 %v29_v12, %v19_v13 }
  0x7b   :  { %v32_v15 = vadd.f32 1e-06, %v30_v14 }
  0x7d   :  { %71 = vrsqrt.f32 %v32_v15  ;;  %vm40_vm3 = vweird.f32 %v32_v15 }
  0x80   :  { %v22_v16 = vpop.xlane.xlu0 %21 }
  0x81   :  { %v31_v17 = vmul.f32 %v29_v12, %v22_v16 }
  0x83   :  { %v72_v18 = vpop.eup %71  ;;  %v33_v19 = vadd.f32 1e-06, %v31_v17 }
  0x84   :  { %v35_v20 = vmul.f32 %v72_v18, %v32_v15  ;;  %vm41_vm2 = vweird.f32 %v72_v18 }
  0x85   :  { %73 = vrsqrt.f32 %v33_v19  ;;  %vm42_vm4 = vmor %vm40_vm3, %vm41_vm2  ;;  %vm50_vm6 = vweird.f32 %v33_v19 }
  0x86   :  { %v36_v21 = vmul.f32 %v72_v18, %v35_v20 }
  0x88   :  { %v37_v22 = vmul.f32 0.5, %v36_v21 }
  0x8a   :  { %v38_v23 = vsub.f32 1.5, %v37_v22 }
  0x8b   :  { %v74_v24 = vpop.eup %73 }
  0x8c   :  { %v39_v25 = vmul.f32 %v72_v18, %v38_v23  ;;  %v45_v26 = vmul.f32 %v74_v24, %v33_v19  ;;  %vm51_vm5 = vweird.f32 %v74_v24 }
  0x8d   :  { %vm52_vm7 = vmor %vm50_vm6, %vm51_vm5 }
  0x8e   :  { %v43_v28 = vsel %vm42_vm4, %v72_v18, %v39_v25  ;;  %v46_v29 = vmul.f32 %v74_v24, %v45_v26 }
  0x8f   :  { %v54_v30 = vmul.f32 %v43_v28, %v11_v0 }
  0x90   :  { %v47_v31 = vmul.f32 0.5, %v46_v29 }
  0x91   :  { %v59_v32 = vmul.f32 %v68_v27, %v54_v30 }
  0x92   :  { %v48_v33 = vsub.f32 1.5, %v47_v31 }
  0x93   :  { %61 = vst.msk [vmem:[%s112_s2] sm:$0xff] %vm16_vm0, %v59_v32 }
  0x94   :  { %v49_v34 = vmul.f32 %v74_v24, %v48_v33 }
  0x96   :  { %v53_v35 = vsel %vm52_vm7, %v74_v24, %v49_v34 }
  0x97   :  { %v55_v36 = vmul.f32 %v53_v35, %v12_v2 }
  0x99   :  { %v60_v37 = vmul.f32 %v68_v27, %v55_v36 }
  0x9b   :  { %62 = vst.msk [vmem:[%s112_s2 + $0x8] sm:$0xff] %vm16_vm0, %v60_v37 }

// kernel: _forward.11
= control target key start
LH: loop header
LB: loop body
LE: loop exit
PB: predicated region body
PF: predicated region fallthrough
CT: control target
= control target key end

     0   :  { %11 = vsyncpa [#allocation3], 0  ;;  %s734_s0 = inlined_call_operand.vmem [shape: f32[2,8,32], index: 0, kind: input, shape index: {}]   ;;  %s735_s1 = inlined_call_operand.vmem [shape: f32[1,32], index: 1, kind: input, shape index: {}]   ;;  %s736_s2 = inlined_call_operand.vmem [shape: bf16[32,128], index: 2, kind: input, shape index: {}]   ;;  %s737_s3 = inlined_call_operand.vmem [shape: s32[2,8,1], index: 3, kind: input, shape index: {}]   ;;  %s738_s4 = inlined_call_operand.hbm [shape: f32[2,8,128], index: 4, kind: output, shape index: {0}]   ;;  %s739_s5 = inlined_call_operand.vmem [shape: f32[2,8,1], index: 5, kind: output, shape index: {1}]  }
   0x1   :  { %13 = vsyncpa [#allocation3 + $0x1], 0  ;;  %s627_s18 = smov 0   ;;  %s629_s19 = smov 0  }
   0x2   :  { %s631_s20 = smov 0   ;;  %s633_s21 = smov 0  }
   0x3 LB: > { %s648_s22 = sadd.s32 4294967295, %s593_s21   ;;  %s456_s23 = sadd.s32 4294967294, %s593_s21   ;;  %s593_s21 = sphi %s633_s21, %s745_s21   ;;  %s589_s20 = sphi %s631_s20, %s744_s20   ;;  %s585_s19 = sphi %s629_s19, %s743_s19   ;;  %s581_s18 = sphi %s627_s18, %s742_s18  }
   0x4   : > { %s652_s24 = sadd.s32 1, %s593_s21   ;;  %s120_s25 = sadd.s32 1, %s589_s20 }
   0x5   : > { %s117_s26 = ssub.s32 %s593_s21, %s652_s24  ;;  %p130_p0 = scmp.ne.s32.totalorder %s589_s20, %s585_s19 }
   0x6   : > { %p118_p1 = scmp.eq.s32.totalorder %s117_s26, 0  ;;  %p131_p2 = scmp.eq.s32.totalorder %s648_s22, 1 }
   0x7   : > { %p136_p3 = scmp.ne.s32.totalorder %s585_s19, %s581_s18  ;;  %p137_p4 = scmp.eq.s32.totalorder %s456_s23, 1 }
   0x8   : > { %s663_s27 = scalar_select %p118_p1, %s589_s20, %s120_s25  }
   0x9   : > { %p665_p5 = por %p131_p2, %p130_p0  ;;  %p669_p6 = por %p137_p4, %p136_p3 }
   0xa   : > { %p459_p7 = scmp.ge.s32.totalorder %s593_s21, 1  ;;  %p201_p8 = scmp.lt.s32.totalorder %s593_s21, 3 }
   0xc   : > { %p202_p9 = pnand %p459_p7, %p201_p8 }
   0xd   : > { %p236_p10 = scmp.lt.s32.totalorder (!%p202_p9), %s648_s22, 1  ;;  %s227_s25 = sand.u32 (!%p202_p9), 1, %s585_s19  }
   0xe   : > { %205 = sbr.rel (%p202_p9) target bundleno = 556 (0x22c), region = 36  ;;  %s460_s26 = sshll.u32 (!%p202_p9), %s227_s25, 3 }
   0xf   : > { %s474_s7 = sshll.u32 (!%p202_p9), %s648_s22, 3  ;;  %s339_s13 = scalar_lea.sflag (!%p202_p9), [#allocation3], %s227_s25 }
  0x10   : > { %s353_s10 = scalar_lea.hbm (!%p202_p9), %s738_s4, %s474_s7  ;;  %s551_s17 = scalar_lea.hbm (!%p202_p9), %s738_s4, 16 }
  0x11   : > { %s357_s12 = sshll.u32 (!%p202_p9), %s353_s10, 4  ;;  %s358_s12 = int_to_ptr.hbm [resolvable:$true] %s357_s12 }
  0x12   : > { %s545_s14 = sshra.s32 (!%p202_p9), %s358_s12, 4  ;;  %s546_s14 = int_to_ptr.hbm [resolvable:$true] %s545_s14 }
  0x13   : > { %s237_s30 = scalar_select %p236_p10, %s648_s22, 1  ;;  %vm252_vm0 = vcmask 261120   ;;  %v595_v3 = vmov 32.0   ;;  %v478_v7 = vld [vmem:[%s736_s2 + $0x8] sm:$0xff]  ;;  %v477_v9 = vld [vmem:[%s736_s2] sm:$0xff]  ;;  %v596_v14 = vmov 0   ;;  %v326_v29 = vlaneseq }
  0x14   : > { %523 = vrcp.f32 %v595_v3  ;;  %307 = vmatpush.bf16.msra.mxu0 %v478_v7  ;;  %520 = vset.pattern.permute.xlu1 %v596_v14  ;;  %v522_v23 = vld [vmem:[%s735_s1] ss:$0 sm:$0xff]  ;;  %s547_s15 = scalar_lea.hbm %s546_s14, 8  ;;  %p552_p0 = scmp.lt.s32.totalorder %s546_s14, %s738_s4 }
  0x15   : > { %s677_s6 = sshll.u32 %s237_s30, 3  ;;  %521 = vset.pattern.permute.xlu0 %v596_v14  ;;  %v327_v30 = vand.u32 127, %v326_v29  ;;  %s229_s30 = scalar_lea.vmem [#allocation2], %s460_s26 }
  0x16   : > { %s239_s9 = scalar_lea.vmem %s734_s0, %s677_s6  ;;  %s243_s16 = scalar_lea.vmem %s737_s3, %s677_s6 }
  0x17   : > { %v249_v0 = vld [vmem:[%s239_s9] sm:$0xff]  ;;  %s355_s11 = sshll.u32 %s229_s30, 4  ;;  %p548_p11 = scmp.ne.s32.totalorder %s546_s14, %s547_s15  ;;  %s356_s11 = int_to_ptr.vmem [resolvable:$true] %s355_s11 }
  0x18   : > { %v251_v1 = vmul.f32 %v249_v0, %v249_v0  ;;  %308 = vmatpush.bf16.msra.mxu0 %v477_v9  ;;  %v315_v12 = vld [vmem:[%s243_s16] sm:$0xff]  ;;  %p553_p1 = scmp.lt.s32.totalorder %s551_s17, %s547_s15 }
  0x19   : > { %329 = vperm.xlu1 %520, %v315_v12   ;;  %p549_p12 = pnand %p548_p11, %p665_p5 }
  0x1a   : > { %v253_v2 = vsel %vm252_vm0, %v251_v1, 0.0  ;;  %v524_v4 = vpop.eup %523  ;;  %p554_p2 = por %p553_p1, %p552_p0 }
  0x1b   : > { %254 = vadd.xlane.f32.xlu0 %v253_v2  ;;  %v257_v5 = vmul.f32 32.0, %v524_v4  ;;  %vm261_vm1 = vweird.f32 %v524_v4  ;;  %p550_p13 = pneg %p549_p12 }
  0x1d   : > { %v258_v6 = vsub.f32 1.0, %v257_v5  ;;  %p555_p3 = pnand %p554_p2, %p550_p13 }
  0x1f   : > { %v259_v8 = vmul.f32 %v524_v4, %v258_v6 }
  0x21   : > { %v260_v10 = vadd.f32 %v524_v4, %v259_v8 }
  0x23   : > { %v262_v11 = vsel %vm261_vm1, %v524_v4, %v260_v10 }
  0x8b   : > { %v330_v31 = vpop.permute.xlu1 %329 }
  0x8c   : > { %vm331_vm5 = vcmp.eq.s32.totalorder %v327_v30, %v330_v31 }
  0x8e   : > { %v255_v13 = vpop.xlane.xlu0 %254 }
  0x8f   : > { %v263_v15 = vmul.f32 %v262_v11, %v255_v13 }
  0x91   : > { %v264_v16 = vadd.f32 1e-06, %v263_v15 }
  0x93   : > { %525 = vrsqrt.f32 %v264_v16  ;;  %vm271_vm3 = vweird.f32 %v264_v16 }
  0x99   : > { %v526_v17 = vpop.eup %525 }
  0x9a   : > { %v266_v18 = vmul.f32 %v526_v17, %v264_v16  ;;  %vm272_vm2 = vweird.f32 %v526_v17 }
  0x9b   : > { %vm273_vm4 = vmor %vm271_vm3, %vm272_vm2 }
  0x9c   : > { %v267_v19 = vmul.f32 %v526_v17, %v266_v18 }
  0x9e   : > { %v268_v20 = vmul.f32 0.5, %v267_v19 }
  0xa0   : > { %v269_v21 = vsub.f32 1.5, %v268_v20 }
  0xa2   : > { %v270_v22 = vmul.f32 %v526_v17, %v269_v21 }
  0xa4   : > { %v274_v24 = vsel %vm273_vm4, %v526_v17, %v270_v22 }
  0xa5   : > { %v275_v25 = vmul.f32 %v274_v24, %v249_v0 }
  0xa7   : > { %v279_v26 = vmul.f32 %v522_v23, %v275_v25 }
  0xa9   : > { %v280_v27 = vmul.f32 0.17677669, %v279_v26 }
  0xab   : > { %v281_v28 = vpack.c.bf16 %v280_v27, %v280_v27 }
  0xad   : > { %472 = vmatmul.msk.bf16.vlgmr.msra.gmra.mxu0 %vm252_vm0, %v281_v28 }
 0x12a   : > { %v310_v32 = vpop.f32.mrf.mxu0 }
 0x12b   : > { %316 = vmax.xlane.f32.xlu0 %v310_v32  ;;  %v332_v33 = vsel %vm331_vm5, %v310_v32, 0.0  ;;  %314 = vst [vmem:[%s229_s30] sm:$0xff] %v310_v32 }
 0x12c   : > { %333 = vadd.xlane.f32.xlu2 %v332_v33 }
 0x132   : > { %v312_v34 = vpop.f32.mrf.mxu0 }
 0x19e   : > { %v317_v35 = vpop.xlane.xlu0 %316 }
 0x19f   : > { %v318_v36 = vsub.f32 %v310_v32, %v317_v35 }
 0x1a1   : > { %v319_v37 = vmul.f32 1.442695, %v318_v36 }
 0x1a3   : > { %527 = vpow2.f32 %v319_v37 }
 0x1a9   : > { %v528_v38 = vpop.eup %527 }
 0x1aa   : > { %321 = vadd.xlane.f32.xlu1 %v528_v38 }
 0x1ab   : > { %558 = shalt.err (!%p555_p3)
}
 0x1ac   : > { %479 = dma.vmem_to_hbm [thread:$0]  (%p665_p5), %s356_s11, 128, %s358_s12, %s339_s13   ;;  %v334_v43 = vpop.xlane.xlu2 %333  ;;  %vm336_vm6 = vcmask 7168  }
 0x1ad   : > { %s247_s7 = scalar_lea.vmem %s739_s5, %s677_s6 }
 0x21d   : > { %v322_v39 = vpop.xlane.xlu1 %321 }
 0x21e   : > { %529 = vlog2.f32 %v322_v39 }
 0x224   : > { %v530_v40 = vpop.eup %529 }
 0x225   : > { %v324_v41 = vmul.f32 0.6931472, %v530_v40 }
 0x227   : > { %v325_v42 = vadd.f32 %v324_v41, %v317_v35 }
 0x229   : > { %v335_v44 = vsub.f32 %v325_v42, %v334_v43 }
 0x22b   : > { %337 = vst.msk [vmem:[%s247_s7] sm:$0xff] %vm336_vm6, %v335_v44 }
 0x22c PF: > { %p485_p4 = scmp.ge.s32.totalorder %s593_s21, 2  ;;  %s372_s28 = sand.u32 1, %s581_s18  }
 0x22d   : > { %s373_s8 = scalar_lea.sflag [#allocation3], %s372_s28 }
 0x22e   : > { %p482_p5 = pnand %p485_p4, %p669_p6 }
 0x230   : > { %p483_p7 = pneg %p482_p5 }
 0x232   : > { %576 = dma.done.wait (%p483_p7), %s373_s8, 128  }
 0x233   : > { %578 = vsyncadd (%p483_p7), %s373_s8, 4294967168  ;;  %p16_p8 = scmp.ge.s32.totalorder %s652_s24, 4   ;;  %s742_s18 = smov %s585_s19 }
 0x234   : > { %s743_s19 = smov %s589_s20  ;;  %s744_s20 = smov %s663_s27 }
 0x235   : > { %s745_s21 = smov %s652_s24  ;;  %18 = sbr.rel (!%p16_p8) target bundleno = 3 (0x3), region = 86 }
 0x23a   :  { %386 = vsyncpa [#allocation3], 1 }
 0x23b   :  { %388 = vsyncpa [#allocation3 + $0x1], 1 }

// kernel: _forward.6
= control target key start
LH: loop header
LB: loop body
LE: loop exit
PB: predicated region body
PF: predicated region fallthrough
CT: control target
= control target key end

     0   :  { %s1096_s30 = smov 0   ;;  %s1228_s0 = inlined_call_operand.vmem [shape: f32[2,8,32], index: 0, kind: input, shape index: {}]   ;;  %s1229_s1 = inlined_call_operand.vmem [shape: f32[1,32], index: 1, kind: input, shape index: {}]   ;;  %s1230_s2 = inlined_call_operand.vmem [shape: bf16[32,96], index: 2, kind: input, shape index: {}]   ;;  %s1231_s3 = inlined_call_operand.vmem [shape: bf16[32,32], index: 3, kind: input, shape index: {}]   ;;  %s1232_s4 = inlined_call_operand.vmem [shape: f32[1,32], index: 4, kind: input, shape index: {}]   ;;  %s1233_s5 = inlined_call_operand.vmem [shape: bf16[32,64], index: 5, kind: input, shape index: {}]   ;;  %s1234_s6 = inlined_call_operand.vmem [shape: bf16[64,32], index: 6, kind: input, shape index: {}]   ;;  %s1235_s7 = inlined_call_operand.vmem [shape: f32[4,8,8], index: 7, kind: input, shape index: {}]   ;;  %s1236_s8 = inlined_call_operand.vmem [shape: f32[2,1,8], index: 8, kind: input, shape index: {}]   ;;  %s1237_s9 = inlined_call_operand.vmem [shape: f32[2,8,32], index: 9, kind: output, shape index: {}]  }
   0x1 LB: > { %s900_s10 = sadd.s32 4294967295, %s1029_s30   ;;  %p904_p0 = scmp.ge.s32.totalorder %s1029_s30, 1  ;;  %s1029_s30 = sphi %s1096_s30, %s19_s30  }
   0x2   : > { %p294_p1 = scmp.lt.s32.totalorder %s1029_s30, 3 }
   0x4   : > { %p295_p2 = pnand %p904_p0, %p294_p1 }
   0x5   : > { %p331_p3 = scmp.lt.s32.totalorder (!%p295_p2), %s900_s10, 1  ;;  %s1032_s24 = smov (!%p295_p2), 120  }
   0x6   : > { %298 = sbr.rel (%p295_p2) target bundleno = 2018 (0x7e2), region = 56  ;;  %s1033_s25 = smov (!%p295_p2), 88  }
   0x7   : > { %s1034_s26 = smov (!%p295_p2), 96   ;;  %s1035_s27 = smov (!%p295_p2), 56  }
   0x8   : > { %s1036_s28 = smov (!%p295_p2), 80   ;;  %s1037_s29 = smov (!%p295_p2), 72  }
   0x9   : > { %s1038_s12 = smov (!%p295_p2), 104   ;;  %s1039_s20 = smov (!%p295_p2), 64  }
   0xb   : > { %s1239_s10 = smov (!%p331_p3, %s900_s10), 1  ;;  %vm346_vm0 = vcmask 261120   ;;  %v1031_v3 = vmov 32.0   ;;  %v966_v7 = vld [vmem:[%s1230_s2 + $0x8] sm:$0xff]  ;;  %v965_v9 = vld [vmem:[%s1230_s2] sm:$0xff]  ;;  %vm422_vm5 = vcmask 64512  }
   0xc   : > { %s905_s11 = sshll.u32 %s1239_s10, 3  ;;  %s337_s14 = scalar_lea.vmem %s1236_s8, %s1239_s10  ;;  %1001 = vrcp.f32 %v1031_v3  ;;  %400 = vmatpush.bf16.msra.mxu0 %v966_v7  ;;  %v999_v21 = vld [vmem:[%s1229_s1] ss:$0 sm:$0xff]  ;;  %v408_v37 = vld [vmem:[%s1235_s7 + $0x8] sm:$0xff]  ;;  %vm692_vm6 = vcmask 130048   ;;  %vm694_vm7 = vcmask 195584  }
   0xd   : > { %s334_s17 = scalar_lea.vmem %s1228_s0, %s905_s11  ;;  %v407_v34 = vld [vmem:[%s1235_s7] sm:$0xff]  ;;  %vm819_vm11 = vcmask 523264   ;;  %s341_s15 = scalar_lea.vmem %s1237_s9, %s905_s11 }
   0xe   : > { %v1116_v0 = vld [vmem:[%s334_s17] sm:$0xff] }
   0xf   : > { %v345_v1 = vmul.f32 %v1116_v0, %v1116_v0  ;;  %v998_v35 = vld [vmem:[%s337_s14] ss:$0 sm:$0xff]  ;;  %s1040_s14 = smov 112  }
  0x10   : > { %401 = vmatpush.bf16.msra.mxu0 %v965_v9  ;;  %v415_v36 = vadd.f32 %v998_v35, %v407_v34  ;;  %v416_v40 = vadd.f32 %v998_v35, %v408_v37  ;;  %v968_v34 = vld [vmem:[%s1231_s3 + $0x8] sm:$0xff] }
  0x11   : > { %v347_v2 = vsel %vm346_vm0, %v345_v1, 0.0 }
  0x12   : > { %348 = vadd.xlane.f32.xlu0 %v347_v2  ;;  %v1002_v4 = vpop.eup %1001  ;;  %v409_v2 = vld [vmem:[%s1235_s7 + $0x10] sm:$0xff] }
  0x13   : > { %v351_v5 = vmul.f32 32.0, %v1002_v4  ;;  %vm355_vm1 = vweird.f32 %v1002_v4  ;;  %v417_v3 = vadd.f32 %v998_v35, %v409_v2  ;;  %v971_v2 = vld [vmem:[%s1234_s6] sm:$0xff] }
  0x15   : > { %v352_v6 = vsub.f32 1.0, %v351_v5 }
  0x17   : > { %v353_v8 = vmul.f32 %v1002_v4, %v352_v6 }
  0x19   : > { %v354_v10 = vadd.f32 %v1002_v4, %v353_v8  ;;  %v410_v8 = vld [vmem:[%s1235_s7 + $0x18] sm:$0xff] }
  0x1a   : > { %v418_v9 = vadd.f32 %v998_v35, %v410_v8  ;;  %v967_v35 = vld [vmem:[%s1231_s3] sm:$0xff] }
  0x1b   : > { %v1127_v11 = vsel %vm355_vm1, %v1002_v4, %v354_v10 }
  0x85   : > { %v349_v12 = vpop.xlane.xlu0 %348 }
  0x86   : > { %v357_v13 = vmul.f32 %v1127_v11, %v349_v12 }
  0x88   : > { %v358_v14 = vadd.f32 1e-06, %v357_v13 }
  0x8a   : > { %1003 = vrsqrt.f32 %v358_v14  ;;  %vm365_vm3 = vweird.f32 %v358_v14 }
  0x90   : > { %v1004_v15 = vpop.eup %1003 }
  0x91   : > { %v360_v16 = vmul.f32 %v1004_v15, %v358_v14  ;;  %vm366_vm2 = vweird.f32 %v1004_v15 }
  0x92   : > { %vm367_vm4 = vmor %vm365_vm3, %vm366_vm2 }
  0x93   : > { %v361_v17 = vmul.f32 %v1004_v15, %v360_v16 }
  0x95   : > { %v362_v18 = vmul.f32 0.5, %v361_v17 }
  0x97   : > { %v363_v19 = vsub.f32 1.5, %v362_v18 }
  0x99   : > { %v364_v20 = vmul.f32 %v1004_v15, %v363_v19 }
  0x9b   : > { %v368_v22 = vsel %vm367_vm4, %v1004_v15, %v364_v20 }
  0x9c   : > { %v369_v23 = vmul.f32 %v368_v22, %v1116_v0 }
  0x9e   : > { %v373_v24 = vmul.f32 %v999_v21, %v369_v23 }
  0xa0   : > { %v374_v25 = vpack.c.bf16 %v373_v24, %v373_v24 }
  0xa2   : > { %915 = vmatmul.msk.bf16.vlgmr.msra.gmra.mxu0 %vm346_vm0, %v374_v25 }
 0x11f   : > { %v1135_v26 = vpop.f32.mrf.mxu0 }
 0x120   : > { %484 = vrot.lane.b32.xlu1 %v1135_v26, %s1032_s24  ;;  %486 = vrot.lane.b32.xlu0 %v1135_v26, %s1033_s25  ;;  %s1041_s25 = smov 40  }
 0x127   : > { %v405_v27 = vpop.f32.mrf.mxu0 }
 0x128   : > { %420 = vrot.lane.b32.xlu1 %v1135_v26, %s1034_s26  ;;  %523 = vrot.lane.b32.xlu0 %v1135_v26, %s1035_s27  ;;  %s1042_s26 = smov 48   ;;  %s1043_s27 = smov 8  }
 0x130   : > { %551 = vrot.lane.b32.xlu0 %v1135_v26, %s1036_s28  ;;  %s1044_s28 = smov 24  }
 0x138   : > { %616 = vrot.lane.b32.xlu0 %v1135_v26, %s1037_s29  ;;  %s1045_s29 = smov 16  }
 0x140   : > { %614 = vrot.lane.b32.xlu0 %v1135_v26, %s1038_s12 }
 0x192   : > { %v485_v28 = vpop.permute.xlu1 %484  ;;  %v487_v29 = vpop.permute.xlu0 %486 }
 0x193   : > { %919 = vmatpush.xpose.msk.msra.mxu3 %vm422_vm5, %v487_v29 }
 0x196   : > { %920 = vmatmul.msk.f32.vlgmr.msra.gmra.mxu3 %vm422_vm5, %v485_v28 }
 0x19a   : > { %v421_v30 = vpop.permute.xlu1 %420  ;;  %v524_v31 = vpop.permute.xlu0 %523 }
 0x19b   : > { %916 = vmatpush.xpose.msk.msra.mxu1 %vm422_vm5, %v421_v30  ;;  %544 = vmatpush.msra.mxu2 %v524_v31 }
 0x19e   : > { %917 = vmatmul.msk.f32.vlgmr.msra.gmra.mxu1 %vm422_vm5, %v1135_v26 }
 0x1a2   : > { %v552_v32 = vpop.permute.xlu0 %551 }
 0x1aa   : > { %v617_v33 = vpop.permute.xlu0 %616 }
 0x1ab   : > { %925 = vmatpush.xpose.msk.msrb.mxu2 %vm422_vm5, %v617_v33 }
 0x1b2   : > { %v615_v63 = vpop.permute.xlu0 %614 }
 0x219   : > { %v509_v42 = vpop.f32.mrf.mxu3 }
 0x21a   : > { %v510_v43 = vadd.f32 %v509_v42, %v416_v40 }
 0x21b   : > { %v444_v38 = vpop.f32.mrf.mxu1 }
 0x21c   : > { %v445_v39 = vadd.f32 %v444_v38, %v415_v36  ;;  %v512_v44 = vsel %vm422_vm5, %v510_v43, -inf }
 0x21e   : > { %v447_v41 = vsel %vm422_vm5, %v445_v39, -inf }
 0x21f   : > { %448 = vmax.xlane.f32.xlu2 %v447_v41 }
 0x227   : > { %513 = vmax.xlane.f32.xlu2 %v512_v44 }
 0x23f   : > { %458 = vrot.lane.b32.xlu2 %v1135_v26, %s1039_s20 }
 0x292   : > { %v449_v45 = vpop.xlane.xlu2 %448 }
 0x293   : > { %v450_v46 = vsub.f32 %v445_v39, %v449_v45 }
 0x295   : > { %v451_v47 = vmul.f32 1.442695, %v450_v46 }
 0x297   : > { %1005 = vpow2.f32 %v451_v47 }
 0x29a   : > { %v514_v48 = vpop.xlane.xlu2 %513 }
 0x29b   : > { %v515_v49 = vsub.f32 %v510_v43, %v514_v48  ;;  %v970_v48 = vld [vmem:[%s1233_s5 + $0x8] sm:$0xff] }
 0x29c   : > { %778 = vmatpush.bf16.msrb.mxu0 %v970_v48 }
 0x29d   : > { %v1006_v50 = vpop.eup %1005  ;;  %v516_v51 = vmul.f32 1.442695, %v515_v49  ;;  %v969_v49 = vld [vmem:[%s1233_s5] sm:$0xff] }
 0x29e   : > { %v453_v52 = vsel %vm422_vm5, %v1006_v50, 0.0 }
 0x29f   : > { %1007 = vpow2.f32 %v516_v51  ;;  %454 = vadd.xlane.f32.xlu1 %v453_v52 }
 0x2a0   : > { %779 = vmatpush.bf16.msrb.mxu0 %v969_v49 }
 0x2a2   : > { %v459_v53 = vpop.permute.xlu2 %458 }
 0x2a3   : > { %479 = vmatpush.msrb.mxu1 %v459_v53 }
 0x2a5   : > { %922 = vmatpush.xpose.msk.msra.mxu1 %vm422_vm5, %v552_v32  ;;  %v1008_v54 = vpop.eup %1007 }
 0x2a6   : > { %v518_v55 = vsel %vm422_vm5, %v1008_v54, 0.0 }
 0x2a7   : > { %519 = vadd.xlane.f32.xlu2 %v518_v55 }
 0x2bf   : > { %549 = vrot.lane.b32.xlu2 %v1135_v26, %s1040_s14 }
 0x312   : > { %v455_v56 = vpop.xlane.xlu1 %454 }
 0x313   : > { %1009 = vrcp.f32 %v455_v56 }
 0x319   : > { %v1010_v57 = vpop.eup %1009 }
 0x31a   : > { %v520_v58 = vpop.xlane.xlu2 %519  ;;  %v457_v59 = vmul.f32 %v1010_v57, %v1006_v50  ;;  %v974_v50 = vld [vmem:[%s1234_s6 + $0x18] sm:$0xff] }
 0x31b   : > { %1011 = vrcp.f32 %v520_v58 }
 0x31c   : > { %918 = vmatmul.msk.f32.vlgmr.msrb.gmra.mxu1 %vm422_vm5, %v457_v59 }
 0x321   : > { %v1012_v60 = vpop.eup %1011 }
 0x322   : > { %v550_v61 = vpop.permute.xlu2 %549  ;;  %v522_v62 = vmul.f32 %v1012_v60, %v1008_v54  ;;  %v972_v54 = vld [vmem:[%s1234_s6 + $0x8] sm:$0xff] }
 0x324   : > { %921 = vmatmul.msk.f32.vlgmr.msra.gmra.mxu2 %vm422_vm5, %v522_v62  ;;  %923 = vmatmul.msk.f32.vlgmr.msra.gmra.mxu1 %vm422_vm5, %v550_v61 }
 0x325   : > { %827 = vmatpush.bf16.msra.mxu2 %v974_v50 }
 0x32c   : > { %926 = vmatmul.msk.f32.vlgmr.msrb.gmra.mxu2 %vm422_vm5, %v615_v63 }
 0x399   : > { %v481_v1 = vpop.f32.mrf.mxu1 }
 0x3a1   : > { %v574_v4 = vpop.f32.mrf.mxu1 }
 0x3a2   : > { %v575_v5 = vadd.f32 %v574_v4, %v417_v3 }
 0x3a4   : > { %v577_v6 = vsel %vm422_vm5, %v575_v5, -inf }
 0x3a5   : > { %578 = vmax.xlane.f32.xlu2 %v577_v6 }
 0x3a7   : > { %v546_v7 = vpop.f32.mrf.mxu2 }
 0x3af   : > { %v639_v10 = vpop.f32.mrf.mxu2 }
 0x3b0   : > { %v640_v12 = vadd.f32 %v639_v10, %v418_v9 }
 0x3b2   : > { %v642_v13 = vsel %vm422_vm5, %v640_v12, -inf }
 0x3b3   : > { %643 = vmax.xlane.f32.xlu1 %v642_v13 }
 0x3bd   : > { %653 = vrot.lane.b32.xlu2 %v1135_v26, %s1041_s25 }
 0x418   : > { %v579_v14 = vpop.xlane.xlu2 %578 }
 0x419   : > { %v580_v15 = vsub.f32 %v575_v5, %v579_v14 }
 0x41b   : > { %v581_v16 = vmul.f32 1.442695, %v580_v15 }
 0x41d   : > { %1013 = vpow2.f32 %v581_v16 }
 0x420   : > { %v654_v17 = vpop.permute.xlu2 %653 }
 0x421   : > { %674 = vmatpush.msrb.mxu1 %v654_v17 }
 0x423   : > { %v1014_v18 = vpop.eup %1013 }
 0x424   : > { %v583_v19 = vsel %vm422_vm5, %v1014_v18, 0.0 }
 0x425   : > { %584 = vadd.xlane.f32.xlu0 %v583_v19 }
 0x426   : > { %v644_v20 = vpop.xlane.xlu1 %643 }
 0x427   : > { %v645_v21 = vsub.f32 %v640_v12, %v644_v20 }
 0x429   : > { %v646_v22 = vmul.f32 1.442695, %v645_v21 }
 0x42b   : > { %1015 = vpow2.f32 %v646_v22 }
 0x431   : > { %v1016_v23 = vpop.eup %1015 }
 0x432   : > { %v648_v24 = vsel %vm422_vm5, %v1016_v23, 0.0 }
 0x433   : > { %649 = vadd.xlane.f32.xlu1 %v648_v24 }
 0x44c   : > { %588 = vrot.lane.b32.xlu1 %v1135_v26, %s1042_s26 }
 0x454   : > { %680 = vrot.lane.b32.xlu1 %v546_v7, %s1043_s27 }
 0x498   : > { %v585_v29 = vpop.xlane.xlu0 %584 }
 0x4a6   : > { %v650_v25 = vpop.xlane.xlu1 %649 }
 0x4a7   : > { %1017 = vrcp.f32 %v650_v25 }
 0x4a8   : > { %1019 = vrcp.f32 %v585_v29 }
 0x4ad   : > { %v1018_v27 = vpop.eup %1017 }
 0x4ae   : > { %v652_v28 = vmul.f32 %v1018_v27, %v1016_v23  ;;  %v1020_v30 = vpop.eup %1019 }
 0x4af   : > { %v587_v32 = vmul.f32 %v1020_v30, %v1014_v18 }
 0x4b0   : > { %927 = vmatmul.msk.f32.vlgmr.msrb.gmra.mxu1 %vm422_vm5, %v652_v28 }
 0x4be   : > { %v589_v31 = vpop.permute.xlu1 %588 }
 0x4bf   : > { %609 = vmatpush.msrb.mxu3 %v589_v31 }
 0x4c0   : > { %924 = vmatmul.msk.f32.vlgmr.msrb.gmra.mxu3 %vm422_vm5, %v587_v32 }
 0x4c1   : > { %722 = vmatpush.bf16.msra.mxu3 %v968_v34 }
 0x4c5   : > { %723 = vmatpush.bf16.msra.mxu3 %v967_v35 }
 0x4c6   : > { %v681_v36 = vpop.permute.xlu1 %680 }
 0x4c7   : > { %v691_v37 = vsel %vm422_vm5, %v481_v1, %v681_v36 }
 0x52d   : > { %v676_v33 = vpop.f32.mrf.mxu1 }
 0x52e   : > { %688 = vrot.lane.b32.xlu1 %v676_v33, %s1044_s28 }
 0x543   : > { %v611_v26 = vpop.f32.mrf.mxu3 }
 0x544   : > { %684 = vrot.lane.b32.xlu0 %v611_v26, %s1045_s29 }
 0x5a0   : > { %v689_v39 = vpop.permute.xlu1 %688 }
 0x5b6   : > { %v685_v38 = vpop.permute.xlu0 %684 }
 0x5b7   : > { %v693_v40 = vsel %vm692_vm6, %v691_v37, %v685_v38 }
 0x5b8   : > { %v695_v41 = vsel %vm694_vm7, %v693_v40, %v689_v39 }
 0x5b9   : > { %v696_v42 = vpack.c.bf16 %v695_v41, %v695_v41 }
 0x5bb   : > { %936 = vmatmul.msk.bf16.vlgmr.msra.gmra.mxu3 %vm346_vm0, %v696_v42 }
 0x63e   : > { %v725_v43 = vpop.f32.mrf.mxu3 }
 0x63f   : > { %v729_v44 = vadd.f32 %v725_v43, %v1116_v0  ;;  %v973_v0 = vld [vmem:[%s1234_s6 + $0x10] sm:$0xff] }
 0x640   : > { %828 = vmatpush.bf16.msra.mxu2 %v973_v0 }
 0x641   : > { %v731_v45 = vmul.f32 %v729_v44, %v729_v44 }
 0x643   : > { %v732_v46 = vsel %vm346_vm0, %v731_v45, 0.0 }
 0x644   : > { %733 = vadd.xlane.f32.xlu1 %v732_v46  ;;  %829 = vmatpush.bf16.msra.mxu2 %v972_v54 }
 0x646   : > { %v727_v47 = vpop.f32.mrf.mxu3 }
 0x648   : > { %830 = vmatpush.bf16.msra.mxu2 %v971_v2 }
 0x6b7   : > { %v734_v51 = vpop.xlane.xlu1 %733 }
 0x6b8   : > { %v735_v52 = vmul.f32 %v734_v51, %v1127_v11  ;;  %v1000_v11 = vld [vmem:[%s1232_s4] ss:$0 sm:$0xff] }
 0x6ba   : > { %v736_v53 = vadd.f32 1e-06, %v735_v52 }
 0x6bc   : > { %1021 = vrsqrt.f32 %v736_v53  ;;  %vm743_vm9 = vweird.f32 %v736_v53 }
 0x6c2   : > { %v1022_v55 = vpop.eup %1021 }
 0x6c3   : > { %v738_v56 = vmul.f32 %v1022_v55, %v736_v53  ;;  %vm744_vm8 = vweird.f32 %v1022_v55 }
 0x6c4   : > { %vm745_vm10 = vmor %vm743_vm9, %vm744_vm8 }
 0x6c5   : > { %v739_v57 = vmul.f32 %v1022_v55, %v738_v56 }
 0x6c7   : > { %v740_v58 = vmul.f32 0.5, %v739_v57 }
 0x6c9   : > { %v741_v59 = vsub.f32 1.5, %v740_v58 }
 0x6cb   : > { %v742_v60 = vmul.f32 %v1022_v55, %v741_v59 }
 0x6cd   : > { %v746_v61 = vsel %vm745_vm10, %v1022_v55, %v742_v60 }
 0x6ce   : > { %v747_v62 = vmul.f32 %v746_v61, %v729_v44 }
 0x6d0   : > { %v751_v63 = vmul.f32 %v1000_v11, %v747_v62 }
 0x6d2   : > { %v752_v1 = vpack.c.bf16 %v751_v63, %v751_v63 }
 0x6d4   : > { %945 = vmatmul.msk.bf16.vlgmr.msrb.gmra.mxu0 %vm346_vm0, %v752_v1 }
 0x751   : > { %v781_v3 = vpop.f32.mrf.mxu0 }
 0x752   : > { %v785_v4 = vmax.f32 %v781_v3, 0.0 }
 0x754   : > { %v786_v5 = vpack.c.bf16 %v785_v4, %v785_v4 }
 0x756   : > { %962 = vmatmul.msk.bf16.vlgmr.msra.gmra.mxu2 %vm819_vm11, %v786_v5 }
 0x759   : > { %v783_v6 = vpop.f32.mrf.mxu0 }
 0x7d9   : > { %v832_v7 = vpop.f32.mrf.mxu2 }
 0x7da   : > { %v836_v8 = vadd.f32 %v832_v7, %v729_v44 }
 0x7dc   : > { %837 = vst.msk [vmem:[%s341_s15] sm:$0xff] %vm346_vm0, %v836_v8 }
 0x7e1   : > { %v834_v9 = vpop.f32.mrf.mxu2 }
 0x7e2 PF: > { %s19_s30 = sadd.s32 1, %s1029_s30  }
 0x7e3   : > { %p16_p4 = scmp.ge.s32.totalorder %s19_s30, 4  }
 0x7e5   :  { %18 = sbr.rel (!%p16_p4) target bundleno = 1 (0x1), region = 89 }

// kernel: _forward.9
= control target key start
LH: loop header
LB: loop body
LE: loop exit
PB: predicated region body
PF: predicated region fallthrough
CT: control target
= control target key end

     0   :  { %s1809_s18 = smov 0   ;;  %s2034_s0 = inlined_call_operand.vmem [shape: f32[2,8,32], index: 0, kind: input, shape index: {}]   ;;  %s2035_s1 = inlined_call_operand.vmem [shape: f32[2,8,32], index: 1, kind: input, shape index: {}]   ;;  %s2036_s2 = inlined_call_operand.vmem [shape: f32[1,32], index: 2, kind: input, shape index: {}]   ;;  %s2037_s3 = inlined_call_operand.vmem [shape: bf16[32,96], index: 3, kind: input, shape index: {}]   ;;  %s2038_s4 = inlined_call_operand.vmem [shape: bf16[32,32], index: 4, kind: input, shape index: {}]   ;;  %s2039_s5 = inlined_call_operand.vmem [shape: f32[1,32], index: 5, kind: input, shape index: {}]   ;;  %s2040_s6 = inlined_call_operand.vmem [shape: bf16[32,32], index: 6, kind: input, shape index: {}]   ;;  %s2041_s7 = inlined_call_operand.vmem [shape: bf16[32,64], index: 7, kind: input, shape index: {}]   ;;  %s2042_s8 = inlined_call_operand.vmem [shape: bf16[32,32], index: 8, kind: input, shape index: {}]   ;;  %s2043_s9 = inlined_call_operand.vmem [shape: f32[1,32], index: 9, kind: input, shape index: {}]   ;;  %s2044_s10 = inlined_call_operand.vmem [shape: bf16[32,64], index: 10, kind: input, shape index: {}]   ;;  %s2045_s11 = inlined_call_operand.vmem [shape: bf16[64,32], index: 11, kind: input, shape index: {}]   ;;  %s2046_s12 = inlined_call_operand.vmem [shape: f32[4,8,8], index: 12, kind: input, shape index: {}]   ;;  %s2047_s13 = inlined_call_operand.vmem [shape: f32[2,8,8], index: 13, kind: input, shape index: {}]   ;;  %s2048_s14 = inlined_call_operand.vmem [shape: f32[2,1,8], index: 14, kind: input, shape index: {}]   ;;  %s2049_s15 = inlined_call_operand.vmem [shape: f32[2,8,32], index: 15, kind: output, shape index: {}]  }
   0x1 LB: > { %s1517_s19 = sadd.s32 4294967295, %s1712_s18   ;;  %p1521_p0 = scmp.ge.s32.totalorder %s1712_s18, 1  ;;  %s1712_s18 = sphi %s1809_s18, %s25_s18  }
   0x2   : > { %p462_p1 = scmp.lt.s32.totalorder %s1712_s18, 3 }
   0x4   : > { %p463_p2 = pnand %p1521_p0, %p462_p1 }
   0x5   : > { %p519_p3 = scmp.lt.s32.totalorder (!%p463_p2), %s1517_s19, 1  ;;  %s2054_s30 = smov (!%p463_p2), 88  }
   0x6   : > { %466 = sbr.rel (%p463_p2) target bundleno = 3172 (0xc64), region = 80  ;;  %s2056_s16 = smov (!%p463_p2), 96  }
   0x7   : > { %s1717_s17 = smov (!%p463_p2), 120   ;;  %s1718_s21 = smov (!%p463_p2), 56  }
   0x8   : > { %s2050_s22 = smov (!%p463_p2), 80   ;;  %s1721_s24 = smov (!%p463_p2), 104  }
   0x9   : > { %s1722_s25 = smov (!%p463_p2), 64   ;;  %s2051_s26 = smov (!%p463_p2), 8  }
   0xa   : > { %s2052_s28 = smov (!%p463_p2), 16   ;;  %s2063_s29 = smov (!%p463_p2), 16  }
   0xb   : > { %s2065_s19 = smov (!%p519_p3, %s1517_s19), 1  ;;  %vm543_vm0 = vcmask 261120   ;;  %v1714_v3 = vmov 32.0   ;;  %v1624_v7 = vld [vmem:[%s2037_s3 + $0x8] sm:$0xff]  ;;  %v1623_v9 = vld [vmem:[%s2037_s3] sm:$0xff]  ;;  %vm616_vm5 = vcmask 64512  }
   0xc   : > { %s1820_s20 = sshll.u32 %s2065_s19, 3  ;;  %1666 = vrcp.f32 %v1714_v3  ;;  %597 = vmatpush.bf16.msra.mxu0 %v1624_v7  ;;  %v1662_v21 = vld [vmem:[%s2036_s2] ss:$0 sm:$0xff]  ;;  %v605_v37 = vld [vmem:[%s2046_s12 + $0x8] sm:$0xff]  ;;  %vm886_vm6 = vcmask 130048   ;;  %vm888_vm7 = vcmask 195584  }
   0xd   : > { %s522_s23 = scalar_lea.vmem %s2034_s0, %s1820_s20  ;;  %s530_s27 = scalar_lea.vmem %s2047_s13, %s1820_s20  ;;  %v604_v33 = vld [vmem:[%s2046_s12] sm:$0xff]  ;;  %vm1412_vm14 = vcmask 523264  }
   0xe   : > { %v1826_v0 = vld [vmem:[%s522_s23] sm:$0xff]  ;;  %s2055_s23 = smov 72  }
   0xf   : > { %v542_v1 = vmul.f32 %v1826_v0, %v1826_v0  ;;  %v608_v34 = vld [vmem:[%s530_s27] sm:$0xff]  ;;  %s2053_s27 = smov 24  }
  0x10   : > { %598 = vmatpush.bf16.msra.mxu0 %v1623_v9  ;;  %v609_v35 = vadd.f32 %v608_v34, %v604_v33  ;;  %v610_v40 = vadd.f32 %v608_v34, %v605_v37 }
  0x11   : > { %v544_v2 = vsel %vm543_vm0, %v542_v1, 0.0  ;;  %v606_v1 = vld [vmem:[%s2046_s12 + $0x10] sm:$0xff] }
  0x12   : > { %545 = vadd.xlane.f32.xlu0 %v544_v2  ;;  %v1667_v4 = vpop.eup %1666  ;;  %v611_v2 = vadd.f32 %v608_v34, %v606_v1 }
  0x13   : > { %v548_v5 = vmul.f32 32.0, %v1667_v4  ;;  %vm552_vm1 = vweird.f32 %v1667_v4 }
  0x15   : > { %v549_v6 = vsub.f32 1.0, %v548_v5 }
  0x17   : > { %v550_v8 = vmul.f32 %v1667_v4, %v549_v6 }
  0x19   : > { %v551_v10 = vadd.f32 %v1667_v4, %v550_v8  ;;  %v607_v8 = vld [vmem:[%s2046_s12 + $0x18] sm:$0xff] }
  0x1a   : > { %v612_v9 = vadd.f32 %v608_v34, %v607_v8  ;;  %v1626_v34 = vld [vmem:[%s2038_s4 + $0x8] sm:$0xff] }
  0x1b   : > { %v1837_v11 = vsel %vm552_vm1, %v1667_v4, %v551_v10 }
  0x85   : > { %v546_v12 = vpop.xlane.xlu0 %545 }
  0x86   : > { %v554_v13 = vmul.f32 %v1837_v11, %v546_v12 }
  0x88   : > { %v555_v14 = vadd.f32 1e-06, %v554_v13 }
  0x8a   : > { %1668 = vrsqrt.f32 %v555_v14  ;;  %vm562_vm3 = vweird.f32 %v555_v14 }
  0x90   : > { %v1669_v15 = vpop.eup %1668 }
  0x91   : > { %v557_v16 = vmul.f32 %v1669_v15, %v555_v14  ;;  %vm563_vm2 = vweird.f32 %v1669_v15 }
  0x92   : > { %vm564_vm4 = vmor %vm562_vm3, %vm563_vm2 }
  0x93   : > { %v558_v17 = vmul.f32 %v1669_v15, %v557_v16 }
  0x95   : > { %v559_v18 = vmul.f32 0.5, %v558_v17 }
  0x97   : > { %v560_v19 = vsub.f32 1.5, %v559_v18 }
  0x99   : > { %v561_v20 = vmul.f32 %v1669_v15, %v560_v19 }
  0x9b   : > { %v565_v22 = vsel %vm564_vm4, %v1669_v15, %v561_v20 }
  0x9c   : > { %v566_v23 = vmul.f32 %v565_v22, %v1826_v0 }
  0x9e   : > { %v570_v24 = vmul.f32 %v1662_v21, %v566_v23 }
  0xa0   : > { %v571_v25 = vpack.c.bf16 %v570_v24, %v570_v24 }
  0xa2   : > { %1534 = vmatmul.msk.bf16.vlgmr.msra.gmra.mxu0 %vm543_vm0, %v571_v25 }
 0x11f   : > { %v1845_v26 = vpop.f32.mrf.mxu0 }
 0x120   : > { %680 = vrot.lane.b32.xlu1 %v1845_v26, %s2054_s30  ;;  %614 = vrot.lane.b32.xlu0 %v1845_v26, %s2056_s16 }
 0x127   : > { %v602_v27 = vpop.f32.mrf.mxu0 }
 0x128   : > { %678 = vrot.lane.b32.xlu1 %v1845_v26, %s1717_s17  ;;  %717 = vrot.lane.b32.xlu0 %v1845_v26, %s1718_s21  ;;  %s1724_s21 = smov 40  }
 0x130   : > { %745 = vrot.lane.b32.xlu0 %v1845_v26, %s2050_s22  ;;  %s1723_s22 = smov 112  }
 0x138   : > { %810 = vrot.lane.b32.xlu0 %v1845_v26, %s2055_s23 }
 0x140   : > { %808 = vrot.lane.b32.xlu0 %v1845_v26, %s1721_s24 }
 0x192   : > { %v681_v28 = vpop.permute.xlu1 %680  ;;  %v615_v29 = vpop.permute.xlu0 %614 }
 0x193   : > { %1535 = vmatpush.xpose.msk.msra.mxu1 %vm616_vm5, %v615_v29  ;;  %1538 = vmatpush.xpose.msk.msrb.mxu0 %vm616_vm5, %v681_v28 }
 0x196   : > { %1536 = vmatmul.msk.f32.vlgmr.msra.gmra.mxu1 %vm616_vm5, %v1845_v26 }
 0x19a   : > { %v679_v30 = vpop.permute.xlu1 %678  ;;  %v718_v31 = vpop.permute.xlu0 %717 }
 0x19b   : > { %1539 = vmatmul.msk.f32.vlgmr.msrb.gmra.mxu0 %vm616_vm5, %v679_v30 }
 0x1a2   : > { %v746_v32 = vpop.permute.xlu0 %745 }
 0x1a3   : > { %1541 = vmatpush.xpose.msk.msrb.mxu1 %vm616_vm5, %v746_v32 }
 0x1aa   : > { %v811_v59 = vpop.permute.xlu0 %810 }
 0x1b2   : > { %v809_v63 = vpop.permute.xlu0 %808 }
 0x213   : > { %v638_v36 = vpop.f32.mrf.mxu1 }
 0x214   : > { %v639_v38 = vadd.f32 %v638_v36, %v609_v35  ;;  %v1625_v35 = vld [vmem:[%s2038_s4] sm:$0xff] }
 0x216   : > { %v641_v39 = vsel %vm616_vm5, %v639_v38, -inf }
 0x217   : > { %642 = vmax.xlane.f32.xlu2 %v641_v39 }
 0x218   : > { %v703_v41 = vpop.f32.mrf.mxu0 }
 0x219   : > { %v704_v42 = vadd.f32 %v703_v41, %v610_v40 }
 0x21b   : > { %v706_v43 = vsel %vm616_vm5, %v704_v42, -inf }
 0x21f   : > { %707 = vmax.xlane.f32.xlu2 %v706_v43  ;;  %v1630_v43 = vld [vmem:[%s2041_s7 + $0x8] sm:$0xff] }
 0x237   : > { %652 = vrot.lane.b32.xlu2 %v1845_v26, %s1722_s25  ;;  %s1725_s25 = smov 48  }
 0x28a   : > { %v643_v44 = vpop.xlane.xlu2 %642 }
 0x28b   : > { %v644_v45 = vsub.f32 %v639_v38, %v643_v44 }
 0x28d   : > { %v645_v46 = vmul.f32 1.442695, %v644_v45 }
 0x28f   : > { %1670 = vpow2.f32 %v645_v46 }
 0x292   : > { %v708_v47 = vpop.xlane.xlu2 %707 }
 0x293   : > { %v709_v48 = vsub.f32 %v704_v42, %v708_v47 }
 0x295   : > { %v1671_v49 = vpop.eup %1670  ;;  %v710_v50 = vmul.f32 1.442695, %v709_v48 }
 0x296   : > { %v647_v51 = vsel %vm616_vm5, %v1671_v49, 0.0 }
 0x297   : > { %1672 = vpow2.f32 %v710_v50  ;;  %648 = vadd.xlane.f32.xlu1 %v647_v51 }
 0x29a   : > { %v653_v52 = vpop.permute.xlu2 %652 }
 0x29b   : > { %673 = vmatpush.msra.mxu2 %v653_v52  ;;  %v1627_v52 = vld [vmem:[%s2040_s6] sm:$0xff] }
 0x29d   : > { %738 = vmatpush.msrb.mxu2 %v718_v31  ;;  %v1673_v53 = vpop.eup %1672 }
 0x29e   : > { %v712_v54 = vsel %vm616_vm5, %v1673_v53, 0.0 }
 0x29f   : > { %713 = vadd.xlane.f32.xlu2 %v712_v54 }
 0x2b7   : > { %743 = vrot.lane.b32.xlu2 %v1845_v26, %s1723_s22 }
 0x30a   : > { %v649_v55 = vpop.xlane.xlu1 %648 }
 0x30b   : > { %1674 = vrcp.f32 %v649_v55 }
 0x311   : > { %v1675_v56 = vpop.eup %1674 }
 0x312   : > { %v714_v57 = vpop.xlane.xlu2 %713  ;;  %v651_v58 = vmul.f32 %v1675_v56, %v1671_v49  ;;  %v1629_v49 = vld [vmem:[%s2041_s7] sm:$0xff] }
 0x313   : > { %1676 = vrcp.f32 %v714_v57 }
 0x314   : > { %1537 = vmatmul.msk.f32.vlgmr.msra.gmra.mxu2 %vm616_vm5, %v651_v58 }
 0x315   : > { %1544 = vmatpush.xpose.msk.msra.mxu2 %vm616_vm5, %v811_v59 }
 0x319   : > { %v1677_v60 = vpop.eup %1676 }
 0x31a   : > { %v744_v61 = vpop.permute.xlu2 %743  ;;  %v716_v62 = vmul.f32 %v1677_v60, %v1673_v53 }
 0x31b   : > { %1542 = vmatmul.msk.f32.vlgmr.msrb.gmra.mxu1 %vm616_vm5, %v744_v61 }
 0x31c   : > { %1540 = vmatmul.msk.f32.vlgmr.msrb.gmra.mxu2 %vm616_vm5, %v716_v62  ;;  %v1663_v62 = vld [vmem:[%s2039_s5] ss:$0 sm:$0xff] }
 0x31d   : > { %1005 = vmatpush.bf16.msrb.mxu2 %v1630_v43 }
 0x321   : > { %1006 = vmatpush.bf16.msrb.mxu2 %v1629_v49 }
 0x324   : > { %1545 = vmatmul.msk.f32.vlgmr.msra.gmra.mxu2 %vm616_vm5, %v809_v63 }
 0x397   : > { %v675_v3 = vpop.f32.mrf.mxu2 }
 0x398   : > { %v768_v4 = vpop.f32.mrf.mxu1 }
 0x399   : > { %v769_v5 = vadd.f32 %v768_v4, %v611_v2 }
 0x39b   : > { %v771_v6 = vsel %vm616_vm5, %v769_v5, -inf }
 0x39c   : > { %772 = vmax.xlane.f32.xlu2 %v771_v6 }
 0x39f   : > { %v740_v7 = vpop.f32.mrf.mxu2 }
 0x3a7   : > { %v833_v10 = vpop.f32.mrf.mxu2 }
 0x3a8   : > { %v834_v12 = vadd.f32 %v833_v10, %v612_v9 }
 0x3aa   : > { %v836_v13 = vsel %vm616_vm5, %v834_v12, -inf }
 0x3ab   : > { %837 = vmax.xlane.f32.xlu1 %v836_v13 }
 0x3b4   : > { %847 = vrot.lane.b32.xlu2 %v1845_v26, %s1724_s21 }
 0x40f   : > { %v773_v14 = vpop.xlane.xlu2 %772 }
 0x410   : > { %v774_v15 = vsub.f32 %v769_v5, %v773_v14 }
 0x412   : > { %v775_v16 = vmul.f32 1.442695, %v774_v15 }
 0x414   : > { %1678 = vpow2.f32 %v775_v16 }
 0x417   : > { %v848_v17 = vpop.permute.xlu2 %847 }
 0x418   : > { %868 = vmatpush.msra.mxu1 %v848_v17 }
 0x41a   : > { %v1679_v18 = vpop.eup %1678 }
 0x41b   : > { %v777_v19 = vsel %vm616_vm5, %v1679_v18, 0.0 }
 0x41c   : > { %778 = vadd.xlane.f32.xlu0 %v777_v19 }
 0x41e   : > { %v838_v20 = vpop.xlane.xlu1 %837 }
 0x41f   : > { %v839_v21 = vsub.f32 %v834_v12, %v838_v20 }
 0x421   : > { %v840_v22 = vmul.f32 1.442695, %v839_v21 }
 0x423   : > { %1680 = vpow2.f32 %v840_v22 }
 0x429   : > { %v1681_v23 = vpop.eup %1680 }
 0x42a   : > { %v842_v24 = vsel %vm616_vm5, %v1681_v23, 0.0 }
 0x42b   : > { %843 = vadd.xlane.f32.xlu1 %v842_v24 }
 0x444   : > { %782 = vrot.lane.b32.xlu1 %v1845_v26, %s1725_s25  ;;  %s2062_s25 = smov 24  }
 0x44c   : > { %874 = vrot.lane.b32.xlu1 %v740_v7, %s2051_s26  ;;  %s2061_s26 = smov 8  }
 0x48f   : > { %v779_v29 = vpop.xlane.xlu0 %778 }
 0x49e   : > { %v844_v25 = vpop.xlane.xlu1 %843 }
 0x49f   : > { %1682 = vrcp.f32 %v844_v25 }
 0x4a0   : > { %1684 = vrcp.f32 %v779_v29 }
 0x4a5   : > { %v1683_v27 = vpop.eup %1682 }
 0x4a6   : > { %v846_v28 = vmul.f32 %v1683_v27, %v1681_v23  ;;  %v1685_v30 = vpop.eup %1684 }
 0x4a7   : > { %v781_v32 = vmul.f32 %v1685_v30, %v1679_v18 }
 0x4a8   : > { %1546 = vmatmul.msk.f32.vlgmr.msra.gmra.mxu1 %vm616_vm5, %v846_v28 }
 0x4b6   : > { %v783_v31 = vpop.permute.xlu1 %782 }
 0x4b7   : > { %803 = vmatpush.msra.mxu3 %v783_v31 }
 0x4b8   : > { %1543 = vmatmul.msk.f32.vlgmr.msra.gmra.mxu3 %vm616_vm5, %v781_v32 }
 0x4b9   : > { %916 = vmatpush.bf16.msrb.mxu3 %v1626_v34 }
 0x4bd   : > { %917 = vmatpush.bf16.msrb.mxu3 %v1625_v35 }
 0x4be   : > { %v875_v36 = vpop.permute.xlu1 %874 }
 0x4bf   : > { %v885_v37 = vsel %vm616_vm5, %v675_v3, %v875_v36 }
 0x525   : > { %v870_v33 = vpop.f32.mrf.mxu1 }
 0x526   : > { %882 = vrot.lane.b32.xlu1 %v870_v33, %s2053_s27 }
 0x53b   : > { %v805_v26 = vpop.f32.mrf.mxu3 }
 0x53c   : > { %878 = vrot.lane.b32.xlu0 %v805_v26, %s2052_s28  ;;  %s526_s28 = scalar_lea.vmem %s2035_s1, %s1820_s20 }
 0x53d   : > { %v540_v50 = vld [vmem:[%s526_s28] sm:$0xff]  ;;  %s533_s28 = scalar_lea.vmem %s2048_s14, %s2065_s19  ;;  %s2057_s19 = smov 96  }
 0x53e   : > { %v979_v51 = vpack.c.bf16 %v540_v50, %v540_v50  ;;  %v1664_v15 = vld [vmem:[%s533_s28] ss:$0 sm:$0xff] }
 0x540   : > { %1573 = vmatmul.msk.bf16.vlgmr.msrb.gmra.mxu2 %vm543_vm0, %v979_v51 }
 0x598   : > { %v883_v39 = vpop.permute.xlu1 %882 }
 0x5ae   : > { %v879_v38 = vpop.permute.xlu0 %878 }
 0x5af   : > { %v887_v40 = vsel %vm886_vm6, %v885_v37, %v879_v38 }
 0x5b0   : > { %v889_v41 = vsel %vm888_vm7, %v887_v40, %v883_v39 }
 0x5b1   : > { %v890_v42 = vpack.c.bf16 %v889_v41, %v889_v41 }
 0x5b3   : > { %1555 = vmatmul.msk.bf16.vlgmr.msrb.gmra.mxu3 %vm543_vm0, %v890_v42 }
 0x5c3   : > { %v1944_v4 = vpop.f32.mrf.mxu2 }
 0x5c4   : > { %1081 = vrot.lane.b32.xlu2 %v1944_v4, %s1717_s17  ;;  %1211 = vrot.lane.b32.xlu0 %v1944_v4, %s1721_s24 }
 0x5c5   : > { %1574 = vmatpush.xpose.msk.msrb.mxu1 %vm616_vm5, %v1944_v4 }
 0x5cb   : > { %v1010_v5 = vpop.f32.mrf.mxu2 }
 0x5cc   : > { %1146 = vrot.lane.b32.xlu2 %v1944_v4, %s1723_s22  ;;  %v1632_v5 = vld [vmem:[%s2042_s8 + $0x8] sm:$0xff] }
 0x61e   : > { %v1082_v8 = vpop.permute.xlu2 %1081 }
 0x61f   : > { %1577 = vmatpush.xpose.msk.msra.mxu3 %vm616_vm5, %v1082_v8 }
 0x626   : > { %v1147_v9 = vpop.permute.xlu2 %1146 }
 0x627   : > { %1580 = vmatpush.xpose.msk.msra.mxu2 %vm616_vm5, %v1147_v9 }
 0x62b   : > { %1315 = vmatpush.bf16.msrb.mxu2 %v1632_v5 }
 0x636   : > { %v919_v44 = vpop.f32.mrf.mxu3  ;;  %v1212_v10 = vpop.permute.xlu0 %1211 }
 0x637   : > { %v1919_v45 = vadd.f32 %v919_v44, %v1826_v0  ;;  %v1628_v0 = vld [vmem:[%s2040_s6 + $0x8] sm:$0xff]  ;;  %1583 = vmatpush.xpose.msk.msrb.mxu3 %vm616_vm5, %v1212_v10 }
 0x638   : > { %972 = vmatpush.bf16.msra.mxu0 %v1628_v0 }
 0x639   : > { %v925_v46 = vmul.f32 %v1919_v45, %v1919_v45 }
 0x63b   : > { %v926_v47 = vsel %vm543_vm0, %v925_v46, 0.0 }
 0x63c   : > { %927 = vadd.xlane.f32.xlu1 %v926_v47  ;;  %973 = vmatpush.bf16.msra.mxu0 %v1627_v52 }
 0x63e   : > { %v921_v48 = vpop.f32.mrf.mxu3 }
 0x6af   : > { %v928_v53 = vpop.xlane.xlu1 %927 }
 0x6b0   : > { %v929_v54 = vmul.f32 %v928_v53, %v1837_v11 }
 0x6b2   : > { %v930_v55 = vadd.f32 1e-06, %v929_v54 }
 0x6b4   : > { %1686 = vrsqrt.f32 %v930_v55  ;;  %vm937_vm9 = vweird.f32 %v930_v55 }
 0x6ba   : > { %v1687_v56 = vpop.eup %1686 }
 0x6bb   : > { %v932_v57 = vmul.f32 %v1687_v56, %v930_v55  ;;  %vm938_vm8 = vweird.f32 %v1687_v56 }
 0x6bc   : > { %vm939_vm10 = vmor %vm937_vm9, %vm938_vm8 }
 0x6bd   : > { %v933_v58 = vmul.f32 %v1687_v56, %v932_v57 }
 0x6bf   : > { %v934_v59 = vmul.f32 0.5, %v933_v58 }
 0x6c1   : > { %v935_v60 = vsub.f32 1.5, %v934_v59 }
 0x6c3   : > { %v936_v61 = vmul.f32 %v1687_v56, %v935_v60 }
 0x6c5   : > { %v940_v63 = vsel %vm939_vm10, %v1687_v56, %v936_v61 }
 0x6c6   : > { %v941_v1 = vmul.f32 %v940_v63, %v1919_v45 }
 0x6c8   : > { %v945_v2 = vmul.f32 %v1663_v62, %v941_v1 }
 0x6ca   : > { %v946_v3 = vpack.c.bf16 %v945_v2, %v945_v2 }
 0x6cc   : > { %1564 = vmatmul.msk.bf16.vlgmr.msra.gmra.mxu0 %vm543_vm0, %v946_v3 }
 0x749   : > { %v975_v6 = vpop.f32.mrf.mxu0 }
 0x74a   : > { %1144 = vrot.lane.b32.xlu2 %v975_v6, %s1723_s22  ;;  %1079 = vrot.lane.b32.xlu0 %v975_v6, %s1717_s17  ;;  %s2058_s17 = smov 72   ;;  %s2060_s22 = smov 80  }
 0x74b   : > { %1575 = vmatmul.msk.f32.vlgmr.msrb.gmra.mxu1 %vm616_vm5, %v975_v6 }
 0x751   : > { %v977_v7 = vpop.f32.mrf.mxu0 }
 0x752   : > { %1209 = vrot.lane.b32.xlu0 %v975_v6, %s1721_s24  ;;  %s2059_s24 = smov 88   ;;  %v1631_v6 = vld [vmem:[%s2042_s8] sm:$0xff] }
 0x753   : > { %1316 = vmatpush.bf16.msrb.mxu2 %v1631_v6 }
 0x7a4   : > { %v1145_v12 = vpop.permute.xlu2 %1144 }
 0x7a5   : > { %1581 = vmatmul.msk.f32.vlgmr.msra.gmra.mxu2 %vm616_vm5, %v1145_v12 }
 0x7bc   : > { %v1080_v13 = vpop.permute.xlu0 %1079 }
 0x7bd   : > { %1578 = vmatmul.msk.f32.vlgmr.msra.gmra.mxu3 %vm616_vm5, %v1080_v13 }
 0x7c4   : > { %v1210_v14 = vpop.permute.xlu0 %1209 }
 0x7c5   : > { %1584 = vmatmul.msk.f32.vlgmr.msrb.gmra.mxu3 %vm616_vm5, %v1210_v14 }
 0x7c8   : > { %v1039_v16 = vpop.f32.mrf.mxu1 }
 0x7c9   : > { %v1040_v17 = vadd.f32 %v1664_v15, %v1039_v16 }
 0x7cb   : > { %v1042_v18 = vsel %vm616_vm5, %v1040_v17, -inf }
 0x7cc   : > { %1043 = vmax.xlane.f32.xlu2 %v1042_v18 }
 0x828   : > { %v1169_v19 = vpop.f32.mrf.mxu2 }
 0x829   : > { %v1170_v20 = vadd.f32 %v1664_v15, %v1169_v19 }
 0x82b   : > { %v1172_v21 = vsel %vm616_vm5, %v1170_v20, -inf }
 0x82c   : > { %1173 = vmax.xlane.f32.xlu1 %v1172_v21  ;;  %v1633_v21 = vld [vmem:[%s2044_s10] sm:$0xff] }
 0x83f   : > { %v1044_v22 = vpop.xlane.xlu2 %1043 }
 0x840   : > { %v1104_v23 = vpop.f32.mrf.mxu3  ;;  %v1045_v25 = vsub.f32 %v1040_v17, %v1044_v22  ;;  %v1638_v22 = vld [vmem:[%s2045_s11 + $0x18] sm:$0xff] }
 0x841   : > { %v1105_v24 = vadd.f32 %v1664_v15, %v1104_v23  ;;  %1420 = vmatpush.bf16.msra.mxu3 %v1638_v22 }
 0x842   : > { %v1046_v28 = vmul.f32 1.442695, %v1045_v25 }
 0x843   : > { %v1107_v27 = vsel %vm616_vm5, %v1105_v24, -inf }
 0x844   : > { %1108 = vmax.xlane.f32.xlu0 %v1107_v27  ;;  %1688 = vpow2.f32 %v1046_v28  ;;  %v1636_v27 = vld [vmem:[%s2045_s11 + $0x8] sm:$0xff] }
 0x848   : > { %v1234_v29 = vpop.f32.mrf.mxu3 }
 0x849   : > { %v1235_v30 = vadd.f32 %v1664_v15, %v1234_v29 }
 0x84a   : > { %v1689_v32 = vpop.eup %1688 }
 0x84b   : > { %v1237_v31 = vsel %vm616_vm5, %v1235_v30, -inf  ;;  %v1048_v33 = vsel %vm616_vm5, %v1689_v32, 0.0 }
 0x84c   : > { %1238 = vmax.xlane.f32.xlu1 %v1237_v31 }
 0x854   : > { %1049 = vadd.xlane.f32.xlu1 %v1048_v33 }
 0x858   : > { %1053 = vrot.lane.b32.xlu0 %v1944_v4, %s2057_s19 }
 0x860   : > { %1248 = vrot.lane.b32.xlu0 %v1944_v4, %s2058_s17  ;;  %s537_s17 = scalar_lea.vmem %s2049_s15, %s1820_s20 }
 0x89f   : > { %v1174_v26 = vpop.xlane.xlu1 %1173 }
 0x8a0   : > { %v1175_v34 = vsub.f32 %v1170_v20, %v1174_v26  ;;  %v1634_v20 = vld [vmem:[%s2044_s10 + $0x8] sm:$0xff] }
 0x8a2   : > { %v1176_v35 = vmul.f32 1.442695, %v1175_v34 }
 0x8a4   : > { %1690 = vpow2.f32 %v1176_v35 }
 0x8aa   : > { %v1691_v36 = vpop.eup %1690 }
 0x8ab   : > { %v1178_v37 = vsel %vm616_vm5, %v1691_v36, 0.0 }
 0x8ac   : > { %1179 = vadd.xlane.f32.xlu2 %v1178_v37  ;;  %v1635_v37 = vld [vmem:[%s2045_s11] sm:$0xff] }
 0x8b7   : > { %v1109_v38 = vpop.xlane.xlu0 %1108 }
 0x8b8   : > { %v1110_v39 = vsub.f32 %v1105_v24, %v1109_v38 }
 0x8ba   : > { %v1111_v40 = vmul.f32 1.442695, %v1110_v39 }
 0x8bc   : > { %1692 = vpow2.f32 %v1111_v40 }
 0x8bf   : > { %v1239_v41 = vpop.xlane.xlu1 %1238 }
 0x8c0   : > { %v1240_v42 = vsub.f32 %v1235_v30, %v1239_v41 }
 0x8c2   : > { %v1693_v43 = vpop.eup %1692  ;;  %v1241_v44 = vmul.f32 1.442695, %v1240_v42 }
 0x8c3   : > { %v1113_v46 = vsel %vm616_vm5, %v1693_v43, 0.0 }
 0x8c4   : > { %1694 = vpow2.f32 %v1241_v44  ;;  %1118 = vrot.lane.b32.xlu2 %v1944_v4, %s2059_s24  ;;  %1114 = vadd.xlane.f32.xlu1 %v1113_v46 }
 0x8c7   : > { %v1050_v47 = vpop.xlane.xlu1 %1049 }
 0x8c8   : > { %1696 = vrcp.f32 %v1050_v47 }
 0x8ca   : > { %v1695_v48 = vpop.eup %1694  ;;  %v1054_v49 = vpop.permute.xlu0 %1053 }
 0x8cb   : > { %1074 = vmatpush.msra.mxu1 %v1054_v49  ;;  %v1243_v50 = vsel %vm616_vm5, %v1695_v48, 0.0 }
 0x8cc   : > { %1244 = vadd.xlane.f32.xlu1 %v1243_v50 }
 0x8ce   : > { %v1697_v51 = vpop.eup %1696 }
 0x8cf   : > { %v1052_v0 = vmul.f32 %v1697_v51, %v1689_v32 }
 0x8d1   : > { %1576 = vmatmul.msk.f32.vlgmr.msra.gmra.mxu1 %vm616_vm5, %v1052_v0 }
 0x8d2   : > { %v1249_v54 = vpop.permute.xlu0 %1248 }
 0x8e5   : > { %1183 = vrot.lane.b32.xlu1 %v1944_v4, %s2060_s22 }
 0x91f   : > { %v1180_v52 = vpop.xlane.xlu2 %1179 }
 0x927   : > { %v1119_v53 = vpop.permute.xlu2 %1118 }
 0x928   : > { %1139 = vmatpush.msrb.mxu0 %v1119_v53 }
 0x92a   : > { %1269 = vmatpush.msra.mxu0 %v1249_v54 }
 0x937   : > { %v1115_v55 = vpop.xlane.xlu1 %1114 }
 0x938   : > { %1698 = vrcp.f32 %v1115_v55 }
 0x93e   : > { %v1699_v56 = vpop.eup %1698 }
 0x93f   : > { %v1117_v57 = vmul.f32 %v1699_v56, %v1693_v43  ;;  %v1245_v58 = vpop.xlane.xlu1 %1244 }
 0x940   : > { %1700 = vrcp.f32 %v1245_v58 }
 0x941   : > { %1579 = vmatmul.msk.f32.vlgmr.msrb.gmra.mxu0 %vm616_vm5, %v1117_v57  ;;  %1702 = vrcp.f32 %v1180_v52 }
 0x946   : > { %v1701_v59 = vpop.eup %1700 }
 0x947   : > { %v1247_v60 = vmul.f32 %v1701_v59, %v1695_v48  ;;  %v1703_v61 = vpop.eup %1702 }
 0x948   : > { %v1182_v62 = vmul.f32 %v1703_v61, %v1691_v36 }
 0x949   : > { %1585 = vmatmul.msk.f32.vlgmr.msra.gmra.mxu0 %vm616_vm5, %v1247_v60 }
 0x94e   : > { %v1076_v3 = vpop.f32.mrf.mxu1 }
 0x957   : > { %v1184_v63 = vpop.permute.xlu1 %1183 }
 0x958   : > { %1204 = vmatpush.msrb.mxu1 %v1184_v63 }
 0x959   : > { %1582 = vmatmul.msk.f32.vlgmr.msrb.gmra.mxu1 %vm616_vm5, %v1182_v62 }
 0x95a   : > { %1371 = vmatpush.bf16.msra.mxu1 %v1634_v20 }
 0x95e   : > { %1372 = vmatpush.bf16.msra.mxu1 %v1633_v21 }
 0x9be   : > { %v1141_v1 = vpop.f32.mrf.mxu0 }
 0x9bf   : > { %1275 = vrot.lane.b32.xlu0 %v1141_v1, %s2061_s26 }
 0x9c6   : > { %v1271_v2 = vpop.f32.mrf.mxu0 }
 0x9c7   : > { %1283 = vrot.lane.b32.xlu1 %v1271_v2, %s2062_s25 }
 0x9d6   : > { %v1206_v4 = vpop.f32.mrf.mxu1 }
 0x9d7   : > { %1279 = vrot.lane.b32.xlu2 %v1206_v4, %s2063_s29 }
 0xa31   : > { %v1276_v7 = vpop.permute.xlu0 %1275  ;;  %v1280_v9 = vpop.permute.xlu2 %1279 }
 0xa32   : > { %v1286_v8 = vsel %vm616_vm5, %v1076_v3, %v1276_v7 }
 0xa33   : > { %v1287_v10 = vsel %vm886_vm6, %v1286_v8, %v1280_v9 }
 0xa39   : > { %v1284_v12 = vpop.permute.xlu1 %1283 }
 0xa3a   : > { %v1288_v13 = vsel %vm888_vm7, %v1287_v10, %v1284_v12 }
 0xa3b   : > { %v1289_v14 = vpack.c.bf16 %v1288_v13, %v1288_v13 }
 0xa3d   : > { %1594 = vmatmul.msk.bf16.vlgmr.msrb.gmra.mxu2 %vm543_vm0, %v1289_v14 }
 0xac0   : > { %v1318_v15 = vpop.f32.mrf.mxu2 }
 0xac1   : > { %v1322_v16 = vadd.f32 %v1318_v15, %v1919_v45  ;;  %v1637_v45 = vld [vmem:[%s2045_s11 + $0x10] sm:$0xff] }
 0xac2   : > { %1421 = vmatpush.bf16.msra.mxu3 %v1637_v45 }
 0xac3   : > { %v1324_v17 = vmul.f32 %v1322_v16, %v1322_v16 }
 0xac5   : > { %v1325_v18 = vsel %vm543_vm0, %v1324_v17, 0.0 }
 0xac6   : > { %1326 = vadd.xlane.f32.xlu0 %v1325_v18  ;;  %1422 = vmatpush.bf16.msra.mxu3 %v1636_v27 }
 0xac8   : > { %v1320_v19 = vpop.f32.mrf.mxu2 }
 0xaca   : > { %1423 = vmatpush.bf16.msra.mxu3 %v1635_v37 }
 0xb39   : > { %v1327_v23 = vpop.xlane.xlu0 %1326 }
 0xb3a   : > { %v1328_v24 = vmul.f32 %v1327_v23, %v1837_v11  ;;  %v1665_v11 = vld [vmem:[%s2043_s9] ss:$0 sm:$0xff] }
 0xb3c   : > { %v1329_v25 = vadd.f32 1e-06, %v1328_v24 }
 0xb3e   : > { %1704 = vrsqrt.f32 %v1329_v25  ;;  %vm1336_vm12 = vweird.f32 %v1329_v25 }
 0xb44   : > { %v1705_v28 = vpop.eup %1704 }
 0xb45   : > { %v1331_v29 = vmul.f32 %v1705_v28, %v1329_v25  ;;  %vm1337_vm11 = vweird.f32 %v1705_v28 }
 0xb46   : > { %vm1338_vm13 = vmor %vm1336_vm12, %vm1337_vm11 }
 0xb47   : > { %v1332_v30 = vmul.f32 %v1705_v28, %v1331_v29 }
 0xb49   : > { %v1333_v31 = vmul.f32 0.5, %v1332_v30 }
 0xb4b   : > { %v1334_v32 = vsub.f32 1.5, %v1333_v31 }
 0xb4d   : > { %v1335_v33 = vmul.f32 %v1705_v28, %v1334_v32 }
 0xb4f   : > { %v1339_v26 = vsel %vm1338_vm13, %v1705_v28, %v1335_v33 }
 0xb50   : > { %v1340_v34 = vmul.f32 %v1339_v26, %v1322_v16 }
 0xb52   : > { %v1344_v35 = vmul.f32 %v1665_v11, %v1340_v34 }
 0xb54   : > { %v1345_v36 = vpack.c.bf16 %v1344_v35, %v1344_v35 }
 0xb56   : > { %1603 = vmatmul.msk.bf16.vlgmr.msra.gmra.mxu1 %vm543_vm0, %v1345_v36 }
 0xbd3   : > { %v1374_v38 = vpop.f32.mrf.mxu1 }
 0xbd4   : > { %v1378_v39 = vmax.f32 %v1374_v38, 0.0 }
 0xbd6   : > { %v1379_v40 = vpack.c.bf16 %v1378_v39, %v1378_v39 }
 0xbd8   : > { %1620 = vmatmul.msk.bf16.vlgmr.msra.gmra.mxu3 %vm1412_vm14, %v1379_v40 }
 0xbdb   : > { %v1376_v41 = vpop.f32.mrf.mxu1 }
 0xc5b   : > { %v1425_v42 = vpop.f32.mrf.mxu3 }
 0xc5c   : > { %v1429_v43 = vadd.f32 %v1425_v42, %v1322_v16 }
 0xc5e   : > { %1430 = vst.msk [vmem:[%s537_s17] sm:$0xff] %vm543_vm0, %v1429_v43 }
 0xc63   : > { %v1427_v44 = vpop.f32.mrf.mxu3 }
 0xc64 PF: > { %s25_s18 = sadd.s32 1, %s1712_s18  }
 0xc65   : > { %p22_p4 = scmp.ge.s32.totalorder %s25_s18, 4  }
 0xc67   :  { %24 = sbr.rel (!%p22_p4) target bundleno = 1 (0x1), region = 119 }

</bundles_post_ra>
